<compile_context>
chip_gen: v7x
topology: tpu7x:2x2x1
jax: 0.10.0
libtpu: 0.0.40
codegen_flags: <defaults>
</compile_context>

<pallas_src>
import jax
import jax.numpy as jnp
from jax.experimental import pallas as pl
from jax.experimental.pallas import tpu as pltpu

LANE = 128
SUBLANE = 8


def _round_up(n, m):
    return ((n + m - 1) // m) * m


# ---------------------------------------------------------------------------
# Kernel
# ---------------------------------------------------------------------------
def _make_autoencoder_kernel(num_layers):
    """Kernel running the full encode+decode chain for one batch tile.

    Kernel args: (x_ref, w0, b0, w1, b1, ..., out_ref).
    ReLU on every layer except the representation layer (num_layers//2 - 1)
    and the final reconstruction layer (num_layers - 1), matching the module.
    """
    relu_skip = {num_layers // 2 - 1, num_layers - 1}

    def kernel(x_ref, *refs):
        out_ref = refs[-1]
        param_refs = refs[:-1]

        h = x_ref[...]                              # bf16 tile straight off HBM
        for li in range(num_layers):
            w_ref = param_refs[2 * li]
            b_ref = param_refs[2 * li + 1]
            # bf16 x bf16 -> f32 accumulation on the MXU; f32 epilogue
            # (bias + ReLU) is safe on all generations (v5e has no bf16 VPU).
            acc = jnp.dot(h, w_ref[...],
                          preferred_element_type=jnp.float32) + b_ref[...]
            if li not in relu_skip:
                acc = jnp.maximum(acc, 0.0)
            if li == num_layers - 1:
                out_ref[...] = acc.astype(out_ref.dtype)
            else:
                h = acc.astype(jnp.bfloat16)
        # TODO(synk): torch.nn.Dropout (dropout=None by default) is identity at
        # eval; training-time dropout / fit loop / early stopping not modeled.

    return kernel


# ---------------------------------------------------------------------------
# Wrapper
# ---------------------------------------------------------------------------
def _vmem_capacity_bytes():
    try:
        return int(pltpu.get_tpu_info().vmem_capacity_bytes)
    except Exception:
        return 64 << 20     # conservative fallback (v7x per-TC physical VMEM)


def autoencoder_forward(x, params, *, batch_tile=None, out_dtype=jnp.float32):
    """Runs the autoencoder forward pass with a single pallas_call.

    x: [B, F] float array (cast to bf16 + lane/sublane padded internally).
    params: list of (W[in_pad, out_pad] bf16, b[1, out_pad] f32) per Linear
            layer, already 128-lane padded (see pad_params_for_mxu).
    Returns: [B, F] array of `out_dtype` (padding sliced off).
    """
    B, F = x.shape
    num_layers = len(params)
    F_pad = params[0][0].shape[0]
    assert params[-1][0].shape[1] == F_pad, "last-layer fan_out must match padded F"
    assert F_pad >= F and F_pad % LANE == 0

    out_itemsize = jnp.dtype(out_dtype).itemsize
    param_bytes = sum(int(w.size) * w.dtype.itemsize + int(b.size) * b.dtype.itemsize
                      for (w, b) in params)
    max_width = max(F_pad, max(w.shape[1] for (w, _) in params))

    # ---- generation-aware VMEM budget -> batch tile size ------------------
    vmem_cap = _vmem_capacity_bytes()
    # Bytes per batch row that scale with batch_tile:
    #   double-buffered bf16 x tile, double-buffered out tile,
    #   final-layer f32 accumulator, ~2 live f32-wide intermediates.
    per_row = (2 * F_pad * 2
               + 2 * F_pad * out_itemsize
               + F_pad * 4
               + 2 * max_width * 4)
    headroom = 6 << 20
    budget = int(vmem_cap * 0.75) - param_bytes - headroom
    max_rows = max(SUBLANE, budget // per_row) if budget > 0 else SUBLANE
    # TODO(synk): for very large F where even a minimal tile + single-buffered
    # params exceed VMEM (v7x), layer 0 / last layer would need an F-chunking
    # grid axis; not needed at these shapes.

    if batch_tile is None:
        # Largest power-of-two rows that fit the budget, capped so the grid has
        # at least 2 steps (pipelining + megacore engagement).
        half_b = _round_up(max((B + 1) // 2, SUBLANE), SUBLANE)
        cand = 1024
        while cand > SUBLANE and cand > max_rows:
            cand //= 2
        batch_tile = max(SUBLANE, min(cand, half_b))
    batch_tile = _round_up(batch_tile, SUBLANE)

    B_pad = _round_up(B, batch_tile)
    if B_pad // batch_tile < 2:
        B_pad = 2 * batch_tile
    grid = (B_pad // batch_tile,)

    # ---- input: bf16 + zero padding (exact: zeros propagate as zeros) -----
    xb = x.astype(jnp.bfloat16)
    if (B_pad, F_pad) != (B, F):
        xb = jnp.zeros((B_pad, F_pad), jnp.bfloat16).at[:B, :F].set(xb)

    # ---- specs -------------------------------------------------------------
    x_spec = pl.BlockSpec((batch_tile, F_pad), lambda i: (i, 0))
    out_spec = pl.BlockSpec((batch_tile, F_pad), lambda i: (i, 0))

    in_specs = [x_spec]
    flat_params = []
    for (w, b) in params:
        # Grid-invariant blocks: single-buffer them (no point double-buffering
        # a block whose index never changes) -> halves param VMEM.
        in_specs.append(pl.BlockSpec(w.shape, lambda i: (0, 0),
                                     pipeline_mode=pl.Buffered(1)))
        in_specs.append(pl.BlockSpec(b.shape, lambda i: (0, 0),
                                     pipeline_mode=pl.Buffered(1)))
        flat_params.extend([w, b])

    # ---- explicit scoped-VMEM limit (tiles + params + intermediates) ------
    tile_bytes = (2 * batch_tile * F_pad * 2
                  + 2 * batch_tile * F_pad * out_itemsize
                  + batch_tile * F_pad * 4
                  + 2 * batch_tile * max_width * 4)
    vmem_bytes = tile_bytes + param_bytes + headroom
    vmem_bytes = int(min(max(vmem_bytes, 16 << 20), int(vmem_cap * 0.9)))

    kernel = _make_autoencoder_kernel(num_layers)

    y = pl.pallas_call(
        kernel,
        grid=grid,
        in_specs=in_specs,
        out_specs=out_spec,
        out_shape=jax.ShapeDtypeStruct((B_pad, F_pad), out_dtype),
        compiler_params=pltpu.CompilerParams(
            dimension_semantics=("parallel",),
            vmem_limit_bytes=vmem_bytes),
    )(xb, *flat_params)

    return y[:B, :F]


# ---------------------------------------------------------------------------
# Parameter construction (mirrors AutoEncoder._init_models)
# ---------------------------------------------------------------------------
def _init_linear(key, fan_in, fan_out):
    """Deterministic init matching torch.nn.Linear default bounds.

    Weight returned as [in, out] (transposed vs torch's [out, in]); bias [1, out].
    """
    kw, kb = jax.random.split(key)
    bound = 1.0 / jnp.sqrt(jnp.float32(fan_in))
    w = jax.random.uniform(kw, (fan_in, fan_out), jnp.float32, -bound, bound)
    b = jax.random.uniform(kb, (1, fan_out), jnp.float32, -bound, bound)
    return w, b


def build_autoencoder_params(key, in_features, repr_dim,
                             hidden_n_layers=2, hidden_n_units_first=64,
                             hidden_decrease_rate=0.5):
    """Builds the Linear layers exactly as AutoEncoder._init_models does."""
    hidden = []
    if hidden_n_layers > 0:
        hidden.append(hidden_n_units_first)
        for i in range(1, hidden_n_layers):
            hidden.append(int(hidden[i - 1] * hidden_decrease_rate))

    encoder_sizes = hidden + [repr_dim]
    decoder_sizes = (hidden[::-1] if len(hidden) > 0 else []) + [in_features]

    params = []
    in_dim = in_features
    keys = jax.random.split(key, len(encoder_sizes) + len(decoder_sizes))
    k_idx = 0
    for out_dim in encoder_sizes + decoder_sizes:
        params.append(_init_linear(keys[k_idx], in_dim, out_dim))
        in_dim = out_dim
        k_idx += 1
    return params


def pad_params_for_mxu(params, lane=LANE, weight_dtype=jnp.bfloat16):
    """Zero-pads ALL layer dims (including F on layer 0 in / last layer out) to
    a multiple of `lane`, casts W to bf16 and keeps b in f32.

    Zero padding is exact: padded activation columns stay 0 through bias/ReLU
    (padded biases are 0) and contribute nothing downstream; padded output
    columns are sliced away in the wrapper.
    """
    padded = []
    for (w, b) in params:
        fin, fout = w.shape
        fin_p = _round_up(fin, lane)
        fout_p = _round_up(fout, lane)
        w_p = jnp.zeros((fin_p, fout_p), jnp.float32).at[:fin, :fout].set(w)
        b_p = jnp.zeros((1, fout_p), jnp.float32).at[:, :fout].set(b)
        padded.append((w_p.astype(weight_dtype), b_p))
    return padded


# ---------------------------------------------------------------------------
# Pure-JAX reference (same bf16-matmul / f32-accumulate numerics, unpadded)
# ---------------------------------------------------------------------------
def _reference_forward(x, params_logical):
    n = len(params_logical)
    relu_skip = {n // 2 - 1, n - 1}
    h = x.astype(jnp.bfloat16)
    for i, (w, b) in enumerate(params_logical):
        h = jnp.dot(h, w.astype(jnp.bfloat16),
                    preferred_element_type=jnp.float32) + b.astype(jnp.float32)
        if i not in relu_skip:
            h = jnp.maximum(h, 0.0)
        if i != n - 1:
            h = h.astype(jnp.bfloat16)
    return h


# ---------------------------------------------------------------------------
# Demo / self-test
# ---------------------------------------------------------------------------
if __name__ == "__main__":
    key = jax.random.PRNGKey(0)
    k_x, k_p = jax.random.split(key)

    # Tabular (batch, features) input; F deliberately NOT 128-aligned to
    # exercise the wrapper-side lane padding. Grid ends up as 2 tiles of 128.
    B, F = 256, 200
    REPR_DIM = 16
    H_FIRST = 64          # hidden = [64, 32]

    x = jax.random.normal(k_x, (B, F), dtype=jnp.float32)

    params_logical = build_autoencoder_params(
        k_p, in_features=F, repr_dim=REPR_DIM,
        hidden_n_layers=2, hidden_n_units_first=H_FIRST,
        hidden_decrease_rate=0.5)
    params = pad_params_for_mxu(params_logical)

    y = autoencoder_forward(x, params)
    y = jax.block_until_ready(y)

    y_ref = _reference_forward(x, params_logical)
    assert y.shape == (B, F)
    assert jnp.allclose(y, y_ref.astype(y.dtype), atol=2e-3, rtol=2e-3), \
        "mismatch vs reference"

    print("KERNEL_OK")
</pallas_src>

<mosaic_0001>
module attributes {stable_mosaic.version = 11 : i64} {
  func.func @kernel(%arg0: i32, %arg1: memref<128x256xbf16, #tpu.memory_space<vmem>>, %arg2: memref<256x128xbf16, #tpu.memory_space<vmem>>, %arg3: memref<1x128xf32, #tpu.memory_space<vmem>>, %arg4: memref<128x128xbf16, #tpu.memory_space<vmem>>, %arg5: memref<1x128xf32, #tpu.memory_space<vmem>>, %arg6: memref<128x128xbf16, #tpu.memory_space<vmem>>, %arg7: memref<1x128xf32, #tpu.memory_space<vmem>>, %arg8: memref<128x128xbf16, #tpu.memory_space<vmem>>, %arg9: memref<1x128xf32, #tpu.memory_space<vmem>>, %arg10: memref<128x128xbf16, #tpu.memory_space<vmem>>, %arg11: memref<1x128xf32, #tpu.memory_space<vmem>>, %arg12: memref<128x256xbf16, #tpu.memory_space<vmem>>, %arg13: memref<1x256xf32, #tpu.memory_space<vmem>>, %arg14: memref<128x256xf32, #tpu.memory_space<vmem>>) attributes {dimension_semantics = [#tpu.dimension_semantics<parallel>], iteration_bounds = array<i64: 2>, scalar_prefetch = 0 : i64, scratch_operands = 0 : i64, tpu.core_type = #tpu.core_type<tc>, window_params = [{transform_indices = @transform_0, window_bounds = array<i64: 128, 256>}, {pipeline_mode = #tpu.pipeline_mode<synchronous>, transform_indices = @transform_1, window_bounds = array<i64: 256, 128>}, {pipeline_mode = #tpu.pipeline_mode<synchronous>, transform_indices = @transform_2, window_bounds = array<i64: 1, 128>}, {pipeline_mode = #tpu.pipeline_mode<synchronous>, transform_indices = @transform_3, window_bounds = array<i64: 128, 128>}, {pipeline_mode = #tpu.pipeline_mode<synchronous>, transform_indices = @transform_4, window_bounds = array<i64: 1, 128>}, {pipeline_mode = #tpu.pipeline_mode<synchronous>, transform_indices = @transform_5, window_bounds = array<i64: 128, 128>}, {pipeline_mode = #tpu.pipeline_mode<synchronous>, transform_indices = @transform_6, window_bounds = array<i64: 1, 128>}, {pipeline_mode = #tpu.pipeline_mode<synchronous>, transform_indices = @transform_7, window_bounds = array<i64: 128, 128>}, {pipeline_mode = #tpu.pipeline_mode<synchronous>, transform_indices = @transform_8, window_bounds = array<i64: 1, 128>}, {pipeline_mode = #tpu.pipeline_mode<synchronous>, transform_indices = @transform_9, window_bounds = array<i64: 128, 128>}, {pipeline_mode = #tpu.pipeline_mode<synchronous>, transform_indices = @transform_10, window_bounds = array<i64: 1, 128>}, {pipeline_mode = #tpu.pipeline_mode<synchronous>, transform_indices = @transform_11, window_bounds = array<i64: 128, 256>}, {pipeline_mode = #tpu.pipeline_mode<synchronous>, transform_indices = @transform_12, window_bounds = array<i64: 1, 256>}, {transform_indices = @transform_13, window_bounds = array<i64: 128, 256>}]} {
    %c0 = arith.constant 0 : index
    %c0_0 = arith.constant 0 : index
    %0 = vector.load %arg1[%c0, %c0_0] : memref<128x256xbf16, #tpu.memory_space<vmem>>, vector<128x256xbf16>
    %c0_1 = arith.constant 0 : index
    %c0_2 = arith.constant 0 : index
    %1 = vector.load %arg2[%c0_1, %c0_2] : memref<256x128xbf16, #tpu.memory_space<vmem>>, vector<256x128xbf16>
    %cst = arith.constant dense<0.000000e+00> : vector<128x128xf32>
    %2 = tpu.matmul %0, %1, %cst {dimension_numbers = #tpu.dot_dimension_numbers<[1], [0], [0], [1], [0, 0, 1, 1], [], []>} : vector<128x256xbf16>, vector<256x128xbf16>, vector<128x128xf32> -> vector<128x128xf32>
    %c0_3 = arith.constant 0 : index
    %c0_4 = arith.constant 0 : index
    %3 = vector.load %arg3[%c0_3, %c0_4] : memref<1x128xf32, #tpu.memory_space<vmem>>, vector<1x128xf32>
    %4 = vector.broadcast %3 : vector<1x128xf32> to vector<128x128xf32>
    %5 = arith.addf %2, %4 : vector<128x128xf32>
    %cst_5 = arith.constant 0.000000e+00 : f32
    %6 = vector.broadcast %cst_5 : f32 to vector<128x128xf32>
    %7 = arith.maximumf %5, %6 : vector<128x128xf32>
    %8 = arith.truncf %7 : vector<128x128xf32> to vector<128x128xbf16>
    %c0_6 = arith.constant 0 : index
    %c0_7 = arith.constant 0 : index
    %9 = vector.load %arg4[%c0_6, %c0_7] : memref<128x128xbf16, #tpu.memory_space<vmem>>, vector<128x128xbf16>
    %cst_8 = arith.constant dense<0.000000e+00> : vector<128x128xf32>
    %10 = tpu.matmul %8, %9, %cst_8 {dimension_numbers = #tpu.dot_dimension_numbers<[1], [0], [0], [1], [0, 0, 1, 1], [], []>} : vector<128x128xbf16>, vector<128x128xbf16>, vector<128x128xf32> -> vector<128x128xf32>
    %c0_9 = arith.constant 0 : index
    %c0_10 = arith.constant 0 : index
    %11 = vector.load %arg5[%c0_9, %c0_10] : memref<1x128xf32, #tpu.memory_space<vmem>>, vector<1x128xf32>
    %12 = vector.broadcast %11 : vector<1x128xf32> to vector<128x128xf32>
    %13 = arith.addf %10, %12 : vector<128x128xf32>
    %cst_11 = arith.constant 0.000000e+00 : f32
    %14 = vector.broadcast %cst_11 : f32 to vector<128x128xf32>
    %15 = arith.maximumf %13, %14 : vector<128x128xf32>
    %16 = arith.truncf %15 : vector<128x128xf32> to vector<128x128xbf16>
    %c0_12 = arith.constant 0 : index
    %c0_13 = arith.constant 0 : index
    %17 = vector.load %arg6[%c0_12, %c0_13] : memref<128x128xbf16, #tpu.memory_space<vmem>>, vector<128x128xbf16>
    %cst_14 = arith.constant dense<0.000000e+00> : vector<128x128xf32>
    %18 = tpu.matmul %16, %17, %cst_14 {dimension_numbers = #tpu.dot_dimension_numbers<[1], [0], [0], [1], [0, 0, 1, 1], [], []>} : vector<128x128xbf16>, vector<128x128xbf16>, vector<128x128xf32> -> vector<128x128xf32>
    %c0_15 = arith.constant 0 : index
    %c0_16 = arith.constant 0 : index
    %19 = vector.load %arg7[%c0_15, %c0_16] : memref<1x128xf32, #tpu.memory_space<vmem>>, vector<1x128xf32>
    %20 = vector.broadcast %19 : vector<1x128xf32> to vector<128x128xf32>
    %21 = arith.addf %18, %20 : vector<128x128xf32>
    %22 = arith.truncf %21 : vector<128x128xf32> to vector<128x128xbf16>
    %c0_17 = arith.constant 0 : index
    %c0_18 = arith.constant 0 : index
    %23 = vector.load %arg8[%c0_17, %c0_18] : memref<128x128xbf16, #tpu.memory_space<vmem>>, vector<128x128xbf16>
    %cst_19 = arith.constant dense<0.000000e+00> : vector<128x128xf32>
    %24 = tpu.matmul %22, %23, %cst_19 {dimension_numbers = #tpu.dot_dimension_numbers<[1], [0], [0], [1], [0, 0, 1, 1], [], []>} : vector<128x128xbf16>, vector<128x128xbf16>, vector<128x128xf32> -> vector<128x128xf32>
    %c0_20 = arith.constant 0 : index
    %c0_21 = arith.constant 0 : index
    %25 = vector.load %arg9[%c0_20, %c0_21] : memref<1x128xf32, #tpu.memory_space<vmem>>, vector<1x128xf32>
    %26 = vector.broadcast %25 : vector<1x128xf32> to vector<128x128xf32>
    %27 = arith.addf %24, %26 : vector<128x128xf32>
    %cst_22 = arith.constant 0.000000e+00 : f32
    %28 = vector.broadcast %cst_22 : f32 to vector<128x128xf32>
    %29 = arith.maximumf %27, %28 : vector<128x128xf32>
    %30 = arith.truncf %29 : vector<128x128xf32> to vector<128x128xbf16>
    %c0_23 = arith.constant 0 : index
    %c0_24 = arith.constant 0 : index
    %31 = vector.load %arg10[%c0_23, %c0_24] : memref<128x128xbf16, #tpu.memory_space<vmem>>, vector<128x128xbf16>
    %cst_25 = arith.constant dense<0.000000e+00> : vector<128x128xf32>
    %32 = tpu.matmul %30, %31, %cst_25 {dimension_numbers = #tpu.dot_dimension_numbers<[1], [0], [0], [1], [0, 0, 1, 1], [], []>} : vector<128x128xbf16>, vector<128x128xbf16>, vector<128x128xf32> -> vector<128x128xf32>
    %c0_26 = arith.constant 0 : index
    %c0_27 = arith.constant 0 : index
    %33 = vector.load %arg11[%c0_26, %c0_27] : memref<1x128xf32, #tpu.memory_space<vmem>>, vector<1x128xf32>
    %34 = vector.broadcast %33 : vector<1x128xf32> to vector<128x128xf32>
    %35 = arith.addf %32, %34 : vector<128x128xf32>
    %cst_28 = arith.constant 0.000000e+00 : f32
    %36 = vector.broadcast %cst_28 : f32 to vector<128x128xf32>
    %37 = arith.maximumf %35, %36 : vector<128x128xf32>
    %38 = arith.truncf %37 : vector<128x128xf32> to vector<128x128xbf16>
    %c0_29 = arith.constant 0 : index
    %c0_30 = arith.constant 0 : index
    %39 = vector.load %arg12[%c0_29, %c0_30] : memref<128x256xbf16, #tpu.memory_space<vmem>>, vector<128x256xbf16>
    %cst_31 = arith.constant dense<0.000000e+00> : vector<128x256xf32>
    %40 = tpu.matmul %38, %39, %cst_31 {dimension_numbers = #tpu.dot_dimension_numbers<[1], [0], [0], [1], [0, 0, 1, 1], [], []>} : vector<128x128xbf16>, vector<128x256xbf16>, vector<128x256xf32> -> vector<128x256xf32>
    %c0_32 = arith.constant 0 : index
    %c0_33 = arith.constant 0 : index
    %41 = vector.load %arg13[%c0_32, %c0_33] : memref<1x256xf32, #tpu.memory_space<vmem>>, vector<1x256xf32>
    %42 = vector.broadcast %41 : vector<1x256xf32> to vector<128x256xf32>
    %43 = arith.addf %40, %42 : vector<128x256xf32>
    %c0_34 = arith.constant 0 : index
    %c0_35 = arith.constant 0 : index
    %44 = vector.load %arg14[%c0_34, %c0_35] : memref<128x256xf32, #tpu.memory_space<vmem>>, vector<128x256xf32>
    tpu.vector_store %arg14[%c0_34, %c0_35], %43 {strides = array<i32>} : memref<128x256xf32, #tpu.memory_space<vmem>>, vector<128x256xf32>,
    return
  }
  func.func @transform_0(%arg0: i32) -> (i32, i32) {
    %c0_i32 = arith.constant 0 : i32
    %c0_i32_0 = arith.constant 0 : i32
    return %arg0, %c0_i32 : i32, i32
  }
  func.func @transform_1(%arg0: i32) -> (i32, i32) {
    %c0_i32 = arith.constant 0 : i32
    %c0_i32_0 = arith.constant 0 : i32
    %c0_i32_1 = arith.constant 0 : i32
    return %c0_i32, %c0_i32_0 : i32, i32
  }
  func.func @transform_2(%arg0: i32) -> (i32, i32) {
    %c0_i32 = arith.constant 0 : i32
    %c0_i32_0 = arith.constant 0 : i32
    %c0_i32_1 = arith.constant 0 : i32
    return %c0_i32, %c0_i32_0 : i32, i32
  }
  func.func @transform_3(%arg0: i32) -> (i32, i32) {
    %c0_i32 = arith.constant 0 : i32
    %c0_i32_0 = arith.constant 0 : i32
    %c0_i32_1 = arith.constant 0 : i32
    return %c0_i32, %c0_i32_0 : i32, i32
  }
  func.func @transform_4(%arg0: i32) -> (i32, i32) {
    %c0_i32 = arith.constant 0 : i32
    %c0_i32_0 = arith.constant 0 : i32
    %c0_i32_1 = arith.constant 0 : i32
    return %c0_i32, %c0_i32_0 : i32, i32
  }
  func.func @transform_5(%arg0: i32) -> (i32, i32) {
    %c0_i32 = arith.constant 0 : i32
    %c0_i32_0 = arith.constant 0 : i32
    %c0_i32_1 = arith.constant 0 : i32
    return %c0_i32, %c0_i32_0 : i32, i32
  }
  func.func @transform_6(%arg0: i32) -> (i32, i32) {
    %c0_i32 = arith.constant 0 : i32
    %c0_i32_0 = arith.constant 0 : i32
    %c0_i32_1 = arith.constant 0 : i32
    return %c0_i32, %c0_i32_0 : i32, i32
  }
  func.func @transform_7(%arg0: i32) -> (i32, i32) {
    %c0_i32 = arith.constant 0 : i32
    %c0_i32_0 = arith.constant 0 : i32
    %c0_i32_1 = arith.constant 0 : i32
    return %c0_i32, %c0_i32_0 : i32, i32
  }
  func.func @transform_8(%arg0: i32) -> (i32, i32) {
    %c0_i32 = arith.constant 0 : i32
    %c0_i32_0 = arith.constant 0 : i32
    %c0_i32_1 = arith.constant 0 : i32
    return %c0_i32, %c0_i32_0 : i32, i32
  }
  func.func @transform_9(%arg0: i32) -> (i32, i32) {
    %c0_i32 = arith.constant 0 : i32
    %c0_i32_0 = arith.constant 0 : i32
    %c0_i32_1 = arith.constant 0 : i32
    return %c0_i32, %c0_i32_0 : i32, i32
  }
  func.func @transform_10(%arg0: i32) -> (i32, i32) {
    %c0_i32 = arith.constant 0 : i32
    %c0_i32_0 = arith.constant 0 : i32
    %c0_i32_1 = arith.constant 0 : i32
    return %c0_i32, %c0_i32_0 : i32, i32
  }
  func.func @transform_11(%arg0: i32) -> (i32, i32) {
    %c0_i32 = arith.constant 0 : i32
    %c0_i32_0 = arith.constant 0 : i32
    %c0_i32_1 = arith.constant 0 : i32
    return %c0_i32, %c0_i32_0 : i32, i32
  }
  func.func @transform_12(%arg0: i32) -> (i32, i32) {
    %c0_i32 = arith.constant 0 : i32
    %c0_i32_0 = arith.constant 0 : i32
    %c0_i32_1 = arith.constant 0 : i32
    return %c0_i32, %c0_i32_0 : i32, i32
  }
  func.func @transform_13(%arg0: i32) -> (i32, i32) {
    %c0_i32 = arith.constant 0 : i32
    %c0_i32_0 = arith.constant 0 : i32
    return %arg0, %c0_i32 : i32, i32
  }
}

</mosaic_0001>

<bundles_post_ra>
// kernel: tpu_custom_call.1
= control target key start
LH: loop header
LB: loop body
LE: loop exit
PB: predicated region body
PF: predicated region fallthrough
CT: control target
= control target key end

     0   :  { %s3501_s0 = inlined_call_operand.hbm [shape: bf16[256,256], index: 0, kind: input, shape index: {}]   ;;  %s3502_s1 = inlined_call_operand.hbm [shape: bf16[256,128], index: 1, kind: input, shape index: {}]   ;;  %s3503_s2 = inlined_call_operand.vmem [shape: f32[1,128], index: 2, kind: input, shape index: {}]   ;;  %s3504_s3 = inlined_call_operand.hbm [shape: bf16[128,128], index: 3, kind: input, shape index: {}]   ;;  %s3505_s4 = inlined_call_operand.vmem [shape: f32[1,128], index: 4, kind: input, shape index: {}]   ;;  %s3506_s5 = inlined_call_operand.hbm [shape: bf16[128,128], index: 5, kind: input, shape index: {}]   ;;  %s3507_s6 = inlined_call_operand.vmem [shape: f32[1,128], index: 6, kind: input, shape index: {}]   ;;  %s3508_s7 = inlined_call_operand.hbm [shape: bf16[128,128], index: 7, kind: input, shape index: {}]   ;;  %s3509_s8 = inlined_call_operand.vmem [shape: f32[1,128], index: 8, kind: input, shape index: {}]   ;;  %s3510_s9 = inlined_call_operand.hbm [shape: bf16[128,128], index: 9, kind: input, shape index: {}]   ;;  %s3511_s10 = inlined_call_operand.vmem [shape: f32[1,128], index: 10, kind: input, shape index: {}]   ;;  %s3512_s11 = inlined_call_operand.hbm [shape: bf16[128,256], index: 11, kind: input, shape index: {}]   ;;  %s3513_s12 = inlined_call_operand.vmem [shape: f32[1,256], index: 12, kind: input, shape index: {}]   ;;  %s3514_s13 = inlined_call_operand.hbm [shape: f32[256,256], index: 13, kind: output, shape index: {}]  }
   0x1   :  { %3520 = sst [smem:[#allocation20_spill]] %s3502_s1 }
   0x2   :  { %3521 = sst [smem:[#allocation21_spill]] %s3507_s6 }
   0x3   :  { %3522 = sst [smem:[#allocation22_spill]] %s3509_s8 }
   0x4   :  { %3523 = sst [smem:[#allocation23_spill]] %s3511_s10 }
   0x5   :  { %3524 = sst [smem:[#allocation24_spill]] %s3513_s12 }
   0x6   :  { %3525 = sst [smem:[#allocation25_spill]] %s3514_s13 }
   0x7   :  { %18 = vsyncpa [#allocation3], 0 }
   0x8   :  { %20 = vsyncpa [#allocation3 + $0x1], 0 }
   0x9   :  { %21 = vsyncpa [#allocation6], 0 }
   0xa   :  { %22 = vsyncpa [#allocation9], 0 }
   0xb   :  { %23 = vsyncpa [#allocation12], 0 }
   0xc   :  { %24 = vsyncpa [#allocation4], 0 }
   0xd   :  { %26 = vsyncpa [#allocation4 + $0x1], 0  ;;  %s3014_s25 = smov 0   ;;  %s3016_s26 = smov 0  }
   0xe   :  { %s3018_s27 = smov 0   ;;  %s3020_s28 = smov 0  }
   0xf LB: > { %s2929_s29 = smov [#allocation5]   ;;  %s3035_s14 = sadd.s32 4294967295, %s2927_s28   ;;  %s2927_s28 = sphi %s3020_s28, %s3555_s28   ;;  %s2923_s27 = sphi %s3018_s27, %s3554_s27   ;;  %s2919_s26 = sphi %s3016_s26, %s3553_s26   ;;  %s2915_s25 = sphi %s3014_s25, %s3552_s25  }
  0x10   : > { %s353_s30 = sshll.u32 %s2929_s29, 4  ;;  %p2053_p0 = scmp.ge.s32.totalorder %s2927_s28, 1  ;;  %s3040_s30 = int_to_ptr.vmem [resolvable:$true] %s353_s30 }
  0x11   : > { %p3516_p1 = scmp.eq.s32.totalorder %s3035_s14, 0  ;;  %p341_p2 = scmp.lt.s32.totalorder %s2927_s28, 3 }
  0x12   : > { %s2930_s16 = smov [#allocation8]   ;;  %s2931_s19 = smov [#allocation11]  }
  0x13   : > { %p3042_p3 = pnand %p2053_p0, %p341_p2  ;;  %s385_s17 = sshll.u32 %s2930_s16, 4  ;;  %s3055_s17 = int_to_ptr.vmem [resolvable:$true] %s385_s17 }
  0x14   : > { %s417_s20 = sshll.u32 %s2931_s19, 4  ;;  %s3528_s1 = sld [smem:[#allocation20_spill]]  ;;  %s3057_s20 = int_to_ptr.vmem [resolvable:$true] %s417_s20 }
  0x15   : > { %s3526_s15 = scalar_select %p3042_p3, 1, 0 }
  0x16   : > { %p2469_p5 = pneg %p3042_p3 }
  0x18   : > { %p3051_p6 = pnand %p2469_p5, %p3516_p1 }
  0x1a   : > { %s2651_s23 = scalar_lea.hbm %s3528_s1, 2048  ;;  %p3067_p8 = pneg %p3051_p6 }
  0x1b   : > { %p2652_p7 = scmp.ne.s32.totalorder %s3528_s1, %s2651_s23  ;;  %p2658_p11 = scmp.lt.u32.totalorder %s2651_s23, %s3528_s1 }
  0x1d   : > { %p2654_p9 = pnand %p3067_p8, %p2652_p7 }
  0x1f   : > { %p2655_p10 = pneg %p2654_p9 }
  0x21   : > { %p2660_p12 = pnand %p2658_p11, %p2655_p10 }
  0x23   : > { %2663 = shalt.err (!%p2660_p12)
}
  0x24   : > { %s2664_s21 = scalar_lea.vmem %s3040_s30, 2048  ;;  %p2672_p5 = scmp.lt.s32.totalorder %s3040_s30, %s3040_s30 }
  0x25   : > { %p2665_p13 = scmp.ne.s32.totalorder %s3040_s30, %s2664_s21  ;;  %p2673_p4 = scmp.lt.s32.totalorder %s2664_s21, %s2664_s21 }
  0x27   : > { %p2667_p0 = pnand %p2665_p13, %p3067_p8  ;;  %p2674_p7 = por %p2673_p4, %p2672_p5 }
  0x29   : > { %p2668_p2 = pneg %p2667_p0 }
  0x2b   : > { %p2675_p9 = pnand %p2674_p7, %p2668_p2 }
  0x2d   : > { %2678 = shalt.err (!%p2675_p9)
}
  0x2e   : > { %s2932_s22 = smov 64   ;;  %s2933_s13 = smov 4  }
  0x2f   : > { %2472 = dma.hbm_to_vmem [thread:$0]  (!%p3051_p6), %s3528_s1, 2048, %s3040_s30, [#allocation6], %s2932_s22, %s2932_s22, %s2933_s13  }
  0x30   : > { %s2679_s21 = scalar_lea.hbm %s3506_s5, 1024 }
  0x31   : > { %p2680_p4 = scmp.ne.s32.totalorder %s3506_s5, %s2679_s21  ;;  %p2686_p12 = scmp.lt.u32.totalorder %s2679_s21, %s3506_s5 }
  0x33   : > { %p2682_p10 = pnand %p2680_p4, %p3067_p8 }
  0x35   : > { %p2683_p11 = pneg %p2682_p10 }
  0x37   : > { %p2688_p13 = pnand %p2686_p12, %p2683_p11 }
  0x39   : > { %2691 = shalt.err (!%p2688_p13)
}
  0x3a   : > { %s2692_s30 = scalar_lea.vmem %s3055_s17, 1024  ;;  %p2700_p7 = scmp.lt.s32.totalorder %s3055_s17, %s3055_s17 }
  0x3b   : > { %p2693_p0 = scmp.ne.s32.totalorder %s3055_s17, %s2692_s30  ;;  %p2701_p9 = scmp.lt.s32.totalorder %s2692_s30, %s2692_s30 }
  0x3d   : > { %p2695_p2 = pnand %p2693_p0, %p3067_p8  ;;  %p2702_p4 = por %p2701_p9, %p2700_p7 }
  0x3f   : > { %p2696_p5 = pneg %p2695_p2 }
  0x41   : > { %p2703_p10 = pnand %p2702_p4, %p2696_p5 }
  0x43   : > { %2706 = shalt.err (!%p2703_p10)
}
  0x44   : > { %2478 = dma.hbm_to_vmem [thread:$0]  (!%p3051_p6), %s3506_s5, 1024, %s3055_s17, [#allocation9], %s2932_s22, %s2932_s22, %s2933_s13  }
  0x45   : > { %s2707_s23 = scalar_lea.hbm %s3510_s9, 1024 }
  0x46   : > { %p2708_p11 = scmp.ne.s32.totalorder %s3510_s9, %s2707_s23  ;;  %p2714_p0 = scmp.lt.u32.totalorder %s2707_s23, %s3510_s9 }
  0x48   : > { %p2710_p12 = pnand %p2708_p11, %p3067_p8 }
  0x4a   : > { %p2711_p13 = pneg %p2710_p12 }
  0x4c   : > { %p2716_p2 = pnand %p2714_p0, %p2711_p13 }
  0x4e   : > { %2719 = shalt.err (!%p2716_p2)
}
  0x4f   : > { %s2720_s17 = scalar_lea.vmem %s3057_s20, 1024  ;;  %p2728_p4 = scmp.lt.s32.totalorder %s3057_s20, %s3057_s20 }
  0x50   : > { %p2721_p5 = scmp.ne.s32.totalorder %s3057_s20, %s2720_s17  ;;  %p2729_p10 = scmp.lt.s32.totalorder %s2720_s17, %s2720_s17 }
  0x52   : > { %p2723_p7 = pnand %p2721_p5, %p3067_p8  ;;  %p2730_p11 = por %p2729_p10, %p2728_p4 }
  0x54   : > { %p2724_p9 = pneg %p2723_p7 }
  0x56   : > { %p2731_p12 = pnand %p2730_p11, %p2724_p9 }
  0x58   : > { %2734 = shalt.err (!%p2731_p12)
}
  0x59   : > { %2484 = dma.hbm_to_vmem [thread:$0]  (!%p3051_p6), %s3510_s9, 1024, %s3057_s20, [#allocation12], %s2932_s22, %s2932_s22, %s2933_s13  }
  0x5a   : > { %s2934_s8 = smov [#allocation7]   ;;  %s2935_s12 = smov [#allocation10]  }
  0x5b   : > { %s369_s10 = sshll.u32 %s2934_s8, 4  ;;  %s401_s23 = sshll.u32 %s2935_s12, 4  ;;  %s370_s10 = int_to_ptr.vmem [resolvable:$true] %s369_s10  ;;  %s402_s23 = int_to_ptr.vmem [resolvable:$true] %s401_s23 }
  0x5c   : > { %s2735_s19 = scalar_lea.hbm %s3504_s3, 1024 }
  0x5d   : > { %p2736_p13 = scmp.ne.s32.totalorder %s3504_s3, %s2735_s19  ;;  %p2742_p5 = scmp.lt.u32.totalorder %s2735_s19, %s3504_s3 }
  0x5f   : > { %p2738_p0 = pnand %p2736_p13, %p3067_p8 }
  0x61   : > { %p2739_p2 = pneg %p2738_p0 }
  0x63   : > { %p2744_p7 = pnand %p2742_p5, %p2739_p2 }
  0x65   : > { %2747 = shalt.err (!%p2744_p7)
}
  0x66   : > { %s2748_s20 = scalar_lea.vmem %s370_s10, 1024  ;;  %p2756_p11 = scmp.lt.s32.totalorder %s370_s10, %s370_s10 }
  0x67   : > { %p2749_p9 = scmp.ne.s32.totalorder %s370_s10, %s2748_s20  ;;  %p2757_p12 = scmp.lt.s32.totalorder %s2748_s20, %s2748_s20 }
  0x69   : > { %p2751_p4 = pnand %p2749_p9, %p3067_p8  ;;  %p2758_p1 = por %p2757_p12, %p2756_p11 }
  0x6b   : > { %p2752_p10 = pneg %p2751_p4 }
  0x6d   : > { %p2759_p3 = pnand %p2758_p1, %p2752_p10 }
  0x6f   : > { %2762 = shalt.err (!%p2759_p3)
}
  0x70   : > { %2475 = dma.hbm_to_vmem [thread:$0]  (!%p3051_p6), %s3504_s3, 1024, %s370_s10, [#allocation6], %s2932_s22, %s2932_s22, %s2933_s13  }
  0x71   : > { %s2763_s24 = scalar_lea.hbm %s3508_s7, 1024 }
  0x72   : > { %p2764_p1 = scmp.ne.s32.totalorder %s3508_s7, %s2763_s24  ;;  %p2770_p0 = scmp.lt.u32.totalorder %s2763_s24, %s3508_s7 }
  0x74   : > { %p2766_p3 = pnand %p2764_p1, %p3067_p8 }
  0x76   : > { %p2767_p13 = pneg %p2766_p3 }
  0x78   : > { %p2772_p2 = pnand %p2770_p0, %p2767_p13 }
  0x7a   : > { %2775 = shalt.err (!%p2772_p2)
}
  0x7b   : > { %s2776_s30 = scalar_lea.vmem %s402_s23, 1024  ;;  %p2784_p4 = scmp.lt.s32.totalorder %s402_s23, %s402_s23 }
  0x7c   : > { %p2777_p5 = scmp.ne.s32.totalorder %s402_s23, %s2776_s30  ;;  %p2785_p10 = scmp.lt.s32.totalorder %s2776_s30, %s2776_s30 }
  0x7e   : > { %p2779_p7 = pnand %p2777_p5, %p3067_p8  ;;  %p2786_p11 = por %p2785_p10, %p2784_p4 }
  0x80   : > { %p2780_p9 = pneg %p2779_p7 }
  0x82   : > { %p2787_p12 = pnand %p2786_p11, %p2780_p9 }
  0x84   : > { %2790 = shalt.err (!%p2787_p12)
}
  0x85   : > { %2481 = dma.hbm_to_vmem [thread:$0]  (!%p3051_p6), %s3508_s7, 1024, %s402_s23, [#allocation9], %s2932_s22, %s2932_s22, %s2933_s13  }
  0x86   : > { %s2936_s1 = smov [#allocation13]   ;;  %s2791_s24 = scalar_lea.hbm %s3512_s11, 2048 }
  0x87   : > { %s433_s6 = sshll.u32 %s2936_s1, 4  ;;  %p2792_p1 = scmp.ne.s32.totalorder %s3512_s11, %s2791_s24  ;;  %s434_s6 = int_to_ptr.vmem [resolvable:$true] %s433_s6 }
  0x88   : > { %p2798_p0 = scmp.lt.u32.totalorder %s2791_s24, %s3512_s11 }
  0x89   : > { %p2794_p3 = pnand %p2792_p1, %p3067_p8 }
  0x8b   : > { %p2795_p13 = pneg %p2794_p3 }
  0x8d   : > { %p2800_p2 = pnand %p2798_p0, %p2795_p13 }
  0x8f   : > { %2803 = shalt.err (!%p2800_p2)
}
  0x90   : > { %s2804_s22 = scalar_lea.vmem %s434_s6, 2048  ;;  %p2812_p4 = scmp.lt.s32.totalorder %s434_s6, %s434_s6 }
  0x91   : > { %p2805_p5 = scmp.ne.s32.totalorder %s434_s6, %s2804_s22  ;;  %p2813_p10 = scmp.lt.s32.totalorder %s2804_s22, %s2804_s22 }
  0x93   : > { %p2807_p7 = pnand %p2805_p5, %p3067_p8  ;;  %p2814_p11 = por %p2813_p10, %p2812_p4 }
  0x95   : > { %p2808_p9 = pneg %p2807_p7 }
  0x97   : > { %p2815_p12 = pnand %p2814_p11, %p2808_p9 }
  0x99   : > { %2818 = shalt.err (!%p2815_p12)
}
  0x9a   : > { %s3518_s13 = smov 128   ;;  %s2938_s16 = smov 8  }
  0x9b   : > { %2487 = dma.hbm_to_vmem [thread:$0]  (!%p3051_p6), %s3512_s11, 2048, %s434_s6, [#allocation12], %s3518_s13, %s3518_s13, %s2938_s16  }
  0x9c   : > { %s2052_s10 = sadd.s32 4294967294, %s2927_s28   ;;  %s3208_s20 = sadd.s32 1, %s2927_s28  }
  0x9d   : > { %s36_s1 = ssub.s32 %s2927_s28, %s3208_s20  ;;  %s39_s8 = sadd.s32 1, %s2923_s27 }
  0x9e   : > { %p37_p8 = scmp.eq.s32.totalorder %s36_s1, 0  ;;  %p46_p1 = scmp.ne.s32.totalorder %s2923_s27, %s2919_s26 }
  0x9f   : > { %p47_p3 = scmp.eq.s32.totalorder %s2927_s28, 0  ;;  %p52_p13 = scmp.ne.s32.totalorder %s2919_s26, %s2915_s25 }
  0xa0   : > { %s3219_s18 = scalar_select %p37_p8, %s2923_s27, %s39_s8  }
  0xa1   : > { %p3221_p0 = por %p47_p3, %p46_p1  ;;  %p3531_p2 = scmp.eq.s32.totalorder %s3035_s14, 0 }
  0xa2   : > { %p328_p5 = scmp.eq.s32.totalorder %s3035_s14, 1  ;;  %p334_p7 = scmp.eq.s32.totalorder %s2052_s10, 1 }
  0xa3   : > { %p3227_p6 = por %p3531_p2, %p52_p13  ;;  %p2502_p9 = scmp.lt.s32.totalorder %s2927_s28, 2 }
  0xa4   : > { %s450_s24 = sand.u32 1, %s2923_s27   ;;  %p3234_p4 = por %p328_p5, %p46_p1 }
  0xa5   : > { %p3238_p10 = por %p334_p7, %p52_p13  ;;  %s2061_s21 = sshll.u32 %s450_s24, 7 }
  0xa6   : > { %s3533_s29 = scalar_select %p3234_p4, 1, 0 }
  0xa7   : > { %s3534_s19 = scalar_select %p3238_p10, 1, 0 }
  0xa8   : > { %s2166_s17 = sshll.u32 %s2927_s28, 11  ;;  %s454_s10 = scalar_lea.vmem [#allocation2], %s2061_s21 }
  0xa9   : > { %s3246_s30 = scalar_lea.hbm %s3501_s0, %s2166_s17  ;;  %s462_s1 = sshll.u32 %s454_s10, 4  ;;  %s3248_s1 = int_to_ptr.vmem [resolvable:$true] %s462_s1 }
  0xaa   : > { %p3252_p11 = pnand %p2502_p9, %p3221_p0  ;;  %s3256_s13 = scalar_lea.sflag [#allocation3], %s450_s24 }
  0xab   : > { %s2819_s22 = scalar_lea.hbm %s3246_s30, 2048  ;;  %s2824_s12 = scalar_lea.hbm %s3501_s0, 4096 }
  0xac   : > { %p2820_p12 = scmp.ne.s32.totalorder %s3246_s30, %s2819_s22  ;;  %p2821_p8 = pneg %p3252_p11 }
  0xad   : > { %p2825_p13 = scmp.lt.u32.totalorder %s3246_s30, %s3501_s0  ;;  %p2826_p0 = scmp.lt.u32.totalorder %s2824_s12, %s2819_s22 }
  0xae   : > { %p2822_p1 = pnand %p2821_p8, %p2820_p12  ;;  %p2828_p5 = scmp.lt.u32.totalorder %s2819_s22, %s3246_s30 }
  0xaf   : > { %p2827_p2 = por %p2826_p0, %p2825_p13 }
  0xb0   : > { %p2823_p3 = pneg %p2822_p1 }
  0xb1   : > { %p2829_p7 = por %p2828_p5, %p2827_p2 }
  0xb3   : > { %p2830_p9 = pnand %p2829_p7, %p2823_p3 }
  0xb5   : > { %2833 = shalt.err (!%p2830_p9)
}
  0xb6   : > { %s2834_s24 = scalar_lea.vmem %s3248_s1, 2048  ;;  %s2939_s21 = smov [#allocation2]  }
  0xb7   : > { %p2835_p12 = scmp.ne.s32.totalorder %s3248_s1, %s2834_s24  ;;  %s2839_s17 = sshll.u32 %s2939_s21, 4  ;;  %s2840_s17 = int_to_ptr.vmem [resolvable:$false] %s2839_s17 }
  0xb8   : > { %s2841_s23 = scalar_lea.vmem %s2840_s17, 4096  ;;  %p2842_p4 = scmp.lt.s32.totalorder %s3248_s1, %s2840_s17 }
  0xb9   : > { %p2837_p1 = pnand %p2835_p12, %p2821_p8  ;;  %p2843_p13 = scmp.lt.s32.totalorder %s2841_s23, %s2834_s24 }
  0xbb   : > { %p2838_p10 = pneg %p2837_p1  ;;  %p2844_p0 = por %p2843_p13, %p2842_p4 }
  0xbd   : > { %p2845_p2 = pnand %p2844_p0, %p2838_p10 }
  0xbf   : > { %2848 = shalt.err (!%p2845_p2)
}
  0xc0   : > { %s3536_s22 = smov 128   ;;  %p3537_p8 = scmp.ne.s32.totalorder %s3526_s15, 0 }
  0xc1   : > { %2491 = dma.hbm_to_vmem [thread:$0]  (!%p3252_p11), %s3246_s30, 2048, %s3248_s1, %s3256_s13, %s3536_s22, %s3536_s22, %s2938_s16  }
  0xc2   : > { %474 = sbr.rel (%p3537_p8) target bundleno = 1649 (0x671), region = 72  ;;  %s3290_s12 = sand.u32 (!%p3537_p8), 1, %s2919_s26  }
  0xc3   : > { %s2066_s10 = sshll.u32 (!%p3537_p8), %s3290_s12, 7  ;;  %s477_s24 = scalar_lea.sflag (!%p3537_p8), [#allocation3], %s3290_s12 }
  0xc4   : > { %s3294_s21 = scalar_lea.vmem (!%p3537_p8), [#allocation2], %s2066_s10 }
  0xc9   : > { %2894 = dma.done.wait (%p3227_p6), %s477_s24, 2048  }
  0xca   : > { %2896 = vsyncadd (%p3227_p6), %s477_s24, 4294965248  ;;  %p3538_p4 = scmp.eq.s32.totalorder %s3035_s14, 0 }
  0xcc   : > { %2898 = dma.done.wait (%p3538_p4), [#allocation6], 3072   ;;  %p3539_p10 = pmov %p3538_p4 }
  0xcd   : > { %p3540_p11 = pmov %p3538_p4 }
  0xce   : > { %2900 = vsyncadd (%p3539_p10), [#allocation6], 4294964224 }
  0xcf   : > { %2902 = dma.done.wait (%p3540_p11), [#allocation9], 2048   ;;  %p3541_p3 = pmov %p3538_p4 }
  0xd1   : > { %2904 = vsyncadd (%p3541_p3), [#allocation9], 4294965248  ;;  %p3542_p5 = pmov %p3541_p3 }
  0xd2   : > { %p3543_p7 = pmov %p3541_p3 }
  0xd3   : > { %2906 = dma.done.wait (%p3542_p5), [#allocation12], 3072  }
  0xd4   : > { %2908 = vsyncadd (%p3543_p7), [#allocation12], 4294964224  ;;  %v2555_v0 = vld [vmem:[#allocation5 + $0x40] sm:$0xff]   ;;  %v2557_v2 = vld [vmem:[#allocation5 + $0x48] sm:$0xff]   ;;  %s3544_s8 = sld [smem:[#allocation21_spill]]  ;;  %s3545_s22 = sld [smem:[#allocation22_spill]] }
  0xd5   : > { %v2556_v1 = vld [vmem:[#allocation5] sm:$0xff]   ;;  %2169 = vmatprep.subr.bf16.mxu0 %v2555_v0  ;;  %2425 = vmatprep.subr.bf16.mxu1 %v2555_v0  ;;  %v2558_v3 = vld [vmem:[#allocation5 + $0x8] sm:$0xff]   ;;  %v2559_v4 = vld [vmem:[#allocation5 + $0x50] sm:$0xff]   ;;  %s3547_s16 = sld [smem:[#allocation24_spill]]  ;;  %s2073_s6 = sshll.u32 %s3290_s12, 8 }
  0xd6   : > { %2170 = vmatpush3.bf16.msra.mxu0 %v2556_v1  ;;  %2433 = vmatpush3.bf16.msra.mxu1 %v2556_v1  ;;  %v2560_v5 = vld [vmem:[#allocation5 + $0x10] sm:$0xff]   ;;  %v2561_v6 = vld [vmem:[#allocation5 + $0x58] sm:$0xff]   ;;  %v2563_v8 = vld [vmem:[#allocation5 + $0x60] sm:$0xff]   ;;  %s3386_s30 = scalar_lea.vmem [#allocation14], %s2073_s6  ;;  %s2168_s1 = sshll.u32 %s3035_s14, 12 }
  0xd7   : > { %2171 = vmatprep.subr.bf16.mxu0 %v2557_v2  ;;  %2426 = vmatprep.subr.bf16.mxu1 %v2557_v2  ;;  %v2562_v7 = vld [vmem:[#allocation5 + $0x18] sm:$0xff]   ;;  %v2564_v9 = vld [vmem:[#allocation5 + $0x20] sm:$0xff]   ;;  %v2565_v10 = vld [vmem:[#allocation5 + $0x68] sm:$0xff]   ;;  %s1908_s14 = scalar_lea.sflag [#allocation4], %s3290_s12  ;;  %p3549_p9 = scmp.ne.s32.totalorder %s3533_s29, 0 }
  0xd8   : > { %v2573_v11 = vld [vmem:[%s3294_s21 + $0x4] ss:$8 sps:$4 sm:$0xff]   ;;  %v2567_v13 = vld [vmem:[#allocation5 + $0x70] sm:$0xff]   ;;  %v2569_v16 = vld [vmem:[#allocation5 + $0x78] sm:$0xff]  }
  0xd9   : > { %v2566_v12 = vld [vmem:[#allocation5 + $0x28] sm:$0xff]   ;;  %813 = vmatprep.mubr.bf16.mxu0 %v2573_v11  ;;  %v2568_v15 = vld [vmem:[#allocation5 + $0x30] sm:$0xff]   ;;  %v2570_v17 = vld [vmem:[#allocation5 + $0x38] sm:$0xff]  }
  0xda   : > { %2172 = vmatpush3.bf16.msra.mxu0 %v2558_v3  ;;  %2434 = vmatpush3.bf16.msra.mxu1 %v2558_v3  ;;  %v2581_v14 = vld [vmem:[%s3294_s21 + $0x44] ss:$8 sps:$4 sm:$0xff]   ;;  %v2571_v18 = vld [vmem:[%s3294_s21] ss:$8 sps:$4 sm:$0xff]   ;;  %v2574_v19 = vld [vmem:[%s3294_s21 + $0x14] ss:$8 sps:$4 sm:$0xff]  }
  0xdb   : > { %2173 = vmatprep.subr.bf16.mxu0 %v2559_v4  ;;  %2427 = vmatprep.subr.bf16.mxu1 %v2559_v4  ;;  %v2579_v20 = vld [vmem:[%s3294_s21 + $0x40] ss:$8 sps:$4 sm:$0xff]   ;;  %v2585_v22 = vld [vmem:[%s3294_s21 + $0x54] ss:$8 sps:$4 sm:$0xff]   ;;  %v2576_v25 = vld [vmem:[%s3294_s21 + $0x10] ss:$8 sps:$4 sm:$0xff]  }
  0xdc   : > { %845 = vmatprep.mubr.bf16.mxu1 %v2581_v14  ;;  %v2595_v21 = vld [vmem:[#allocation7] sm:$0xff]   ;;  %v2596_v23 = vld [vmem:[#allocation7 + $0x8] sm:$0xff]   ;;  %v2597_v24 = vld [vmem:[#allocation7 + $0x10] sm:$0xff]  }
  0xdd   : > { %v2577_v26 = vld [vmem:[%s3294_s21 + $0x24] ss:$8 sps:$4 sm:$0xff]   ;;  %v2588_v27 = vld [vmem:[%s3294_s21 + $0x50] ss:$8 sps:$4 sm:$0xff]   ;;  %v2582_v30 = vld [vmem:[%s3294_s21 + $0x20] ss:$8 sps:$4 sm:$0xff]  }
  0xde   : > { %2174 = vmatpush3.bf16.msra.mxu0 %v2560_v5  ;;  %2435 = vmatpush3.bf16.msra.mxu1 %v2560_v5  ;;  %v2589_v28 = vld [vmem:[%s3294_s21 + $0x64] ss:$8 sps:$4 sm:$0xff]   ;;  %v2598_v29 = vld [vmem:[#allocation7 + $0x18] sm:$0xff]   ;;  %v2591_v32 = vld [vmem:[%s3294_s21 + $0x60] ss:$8 sps:$4 sm:$0xff]  }
  0xdf   : > { %2175 = vmatprep.subr.bf16.mxu0 %v2561_v6  ;;  %2428 = vmatprep.subr.bf16.mxu1 %v2561_v6  ;;  %v2583_v31 = vld [vmem:[%s3294_s21 + $0x34] ss:$8 sps:$4 sm:$0xff]   ;;  %v2587_v34 = vld [vmem:[%s3294_s21 + $0x30] ss:$8 sps:$4 sm:$0xff]   ;;  %v2599_v36 = vld [vmem:[#allocation7 + $0x20] sm:$0xff]  }
  0xe0   : > { %v2592_v33 = vld [vmem:[%s3294_s21 + $0x74] ss:$8 sps:$4 sm:$0xff]   ;;  %v2594_v35 = vld [vmem:[%s3294_s21 + $0x70] ss:$8 sps:$4 sm:$0xff]   ;;  %v2600_v37 = vld [vmem:[#allocation7 + $0x28] sm:$0xff]   ;;  %s3546_s21 = sld [smem:[#allocation23_spill]] }
  0xe1   : > { %v2601_v38 = vld [vmem:[#allocation7 + $0x30] sm:$0xff]   ;;  %v2602_v39 = vld [vmem:[#allocation7 + $0x38] sm:$0xff]   ;;  %v3328_v40 = vld [vmem:[#allocation8] sm:$0xff]  }
  0xe2   : > { %2176 = vmatpush3.bf16.msra.mxu0 %v2562_v7  ;;  %2436 = vmatpush3.bf16.msra.mxu1 %v2562_v7  ;;  %v3334_v42 = vld [vmem:[%s3503_s2] ss:$0 sm:$0xff] }
  0xe3   : > { %2177 = vmatprep.subr.bf16.mxu0 %v2563_v8  ;;  %2429 = vmatprep.subr.bf16.mxu1 %v2563_v8 }
  0xe6   : > { %2178 = vmatpush3.bf16.msra.mxu0 %v2564_v9  ;;  %2437 = vmatpush3.bf16.msra.mxu1 %v2564_v9 }
  0xe7   : > { %2179 = vmatprep.subr.bf16.mxu0 %v2565_v10  ;;  %2430 = vmatprep.subr.bf16.mxu1 %v2565_v10 }
  0xea   : > { %2180 = vmatpush3.bf16.msra.mxu0 %v2566_v12  ;;  %2438 = vmatpush3.bf16.msra.mxu1 %v2566_v12 }
  0xeb   : > { %2181 = vmatprep.subr.bf16.mxu0 %v2567_v13  ;;  %2431 = vmatprep.subr.bf16.mxu1 %v2567_v13 }
  0xee   : > { %2182 = vmatpush3.bf16.msra.mxu0 %v2568_v15  ;;  %2439 = vmatpush3.bf16.msra.mxu1 %v2568_v15 }
  0xef   : > { %2183 = vmatprep.subr.bf16.mxu0 %v2569_v16  ;;  %2432 = vmatprep.subr.bf16.mxu1 %v2569_v16 }
  0xf2   : > { %2184 = vmatpush3.bf16.msra.mxu0 %v2570_v17  ;;  %2440 = vmatpush3.bf16.msra.mxu1 %v2570_v17 }
  0xf3   : > { %2297 = vmatprep.subr.bf16.mxu1 %v2595_v21 }
  0xf5   : > { %814 = vmatmul.mubr.bf16.vlgmr.msra.gmra.mrb[0].mxu0 %v2571_v18  ;;  %846 = vmatmul.mubr.bf16.vlgmr.msra.gmra.mrb[0].mxu1 %v2579_v20 }
  0xf6   : > { %821 = vmatprep.mubr.bf16.mxu0 %v2574_v19  ;;  %853 = vmatprep.mubr.bf16.mxu1 %v2585_v22 }
  0xf7   : > { %2298 = vmatpush3.bf16.msra.mxu1 %v2595_v21 }
  0xf8   : > { %2299 = vmatprep.subr.bf16.mxu1 %v2596_v23 }
  0xfb   : > { %2300 = vmatpush3.bf16.msra.mxu1 %v2596_v23 }
  0xfc   : > { %2301 = vmatprep.subr.bf16.mxu1 %v2597_v24 }
  0xfd   : > { %822 = vmatmul.mubr.bf16.gmra.mrb[4].mxu0 %v2576_v25  ;;  %854 = vmatmul.mubr.bf16.gmra.mrb[4].mxu1 %v2588_v27  ;;  %v2604_v27 = vld [vmem:[#allocation8 + $0x8] sm:$0xff]  }
  0xfe   : > { %829 = vmatprep.mubr.bf16.mxu0 %v2577_v26  ;;  %861 = vmatprep.mubr.bf16.mxu1 %v2589_v28 }
  0xff   : > { %2302 = vmatpush3.bf16.msra.mxu1 %v2597_v24 }
 0x100   : > { %2303 = vmatprep.subr.bf16.mxu1 %v2598_v29 }
 0x103   : > { %2304 = vmatpush3.bf16.msra.mxu1 %v2598_v29 }
 0x104   : > { %2305 = vmatprep.subr.bf16.mxu1 %v2599_v36 }
 0x105   : > { %830 = vmatmul.mubr.bf16.gmra.mrb[8].mxu0 %v2582_v30  ;;  %862 = vmatmul.mubr.bf16.gmra.mrb[8].mxu1 %v2591_v32 }
 0x106   : > { %837 = vmatprep.mubr.bf16.mxu0 %v2583_v31  ;;  %869 = vmatprep.mubr.bf16.mxu1 %v2592_v33 }
 0x107   : > { %2306 = vmatpush3.bf16.msra.mxu1 %v2599_v36 }
 0x108   : > { %2307 = vmatprep.subr.bf16.mxu1 %v2600_v37 }
 0x10b   : > { %2308 = vmatpush3.bf16.msra.mxu1 %v2600_v37 }
 0x10c   : > { %2309 = vmatprep.subr.bf16.mxu1 %v2601_v38 }
 0x10d   : > { %838 = vmatmul.mubr.bf16.gmra.mrb[12].mxu0 %v2587_v34  ;;  %870 = vmatmul.mubr.bf16.gmra.mrb[12].mxu1 %v2594_v35 }
 0x10f   : > { %2310 = vmatpush3.bf16.msra.mxu1 %v2601_v38  ;;  %v2605_v38 = vld [vmem:[#allocation8 + $0x10] sm:$0xff]  }
 0x110   : > { %2311 = vmatprep.subr.bf16.mxu1 %v2602_v39 }
 0x113   : > { %2312 = vmatpush3.bf16.msra.mxu1 %v2602_v39 }
 0x114   : > { %2329 = vmatprep.subr.bf16.mxu1 %v3328_v40 }
 0x1c8   : > { %v2185_v41 = vpop.f32.mrb[0].mxu0  ;;  %v2209_v44 = vpop.f32.mrb[0].mxu1 }
 0x1c9   : > { %v2186_v43 = vpop.f32.mrb[1].mxu0  ;;  %v2210_v47 = vpop.f32.mrb[1].mxu1 }
 0x1ca   : > { %v2187_v45 = vadd.f32 %v2186_v43, %v2185_v41  ;;  %v2188_v46 = vpop.f32.mrb[2].mxu0  ;;  %v2211_v49 = vadd.f32 %v2210_v47, %v2209_v44  ;;  %v2212_v50 = vpop.f32.mrb[2].mxu1 }
 0x1cb   : > { %v2189_v48 = vpop.f32.mrb[3].mxu0  ;;  %v2213_v53 = vpop.f32.mrb[3].mxu1 }
 0x1cc   : > { %v816_v51 = vadd.f32 %v2187_v45, %v3334_v42  ;;  %v2190_v52 = vadd.f32 %v2189_v48, %v2188_v46  ;;  %v848_v54 = vadd.f32 %v2211_v49, %v3334_v42  ;;  %v2214_v55 = vadd.f32 %v2213_v53, %v2212_v50 }
 0x1ce   : > { %v819_v56 = vadd.f32 %v2190_v52, %v3334_v42  ;;  %v886_v57 = vmax.f32 %v848_v54, 0.0  ;;  %v851_v58 = vadd.f32 %v2214_v55, %v3334_v42  ;;  %v878_v59 = vmax.f32 %v816_v51, 0.0 }
 0x1d0   : > { %v879_v60 = vmax.f32 %v819_v56, 0.0  ;;  %v2191_v61 = vpop.f32.mrb[4].mxu0  ;;  %v887_v63 = vmax.f32 %v851_v58, 0.0  ;;  %v2215_v0 = vpop.f32.mrb[4].mxu1 }
 0x1d1   : > { %v2192_v62 = vpop.f32.mrb[5].mxu0  ;;  %v2216_v4 = vpop.f32.mrb[5].mxu1 }
 0x1d2   : > { %v2193_v1 = vadd.f32 %v2192_v62, %v2191_v61  ;;  %v2194_v2 = vpop.f32.mrb[6].mxu0  ;;  %v894_v3 = vpack.c.bf16 %v879_v60, %v878_v59  ;;  %v2217_v6 = vadd.f32 %v2216_v4, %v2215_v0  ;;  %v2218_v7 = vpop.f32.mrb[6].mxu1  ;;  %v3340_v8 = vpack.c.bf16 %v887_v63, %v886_v57  ;;  %v2607_v63 = vld [vmem:[#allocation8 + $0x20] sm:$0xff]  }
 0x1d3   : > { %v2195_v5 = vpop.f32.mrb[7].mxu0  ;;  %v2219_v11 = vpop.f32.mrb[7].mxu1 }
 0x1d4   : > { %v824_v9 = vadd.f32 %v2193_v1, %v3334_v42  ;;  %v2196_v10 = vadd.f32 %v2195_v5, %v2194_v2  ;;  %2313 = vmatprep.mubr.bf16.mxu1 %v894_v3  ;;  %v856_v12 = vadd.f32 %v2217_v6, %v3334_v42  ;;  %v2220_v13 = vadd.f32 %v2219_v11, %v2218_v7  ;;  %v2608_v6 = vld [vmem:[#allocation8 + $0x28] sm:$0xff]  }
 0x1d5   : > { %v2612_v11 = vld [vmem:[#allocation10 + $0x8] sm:$0xff]  }
 0x1d6   : > { %v827_v14 = vadd.f32 %v2196_v10, %v3334_v42  ;;  %v888_v15 = vmax.f32 %v856_v12, 0.0  ;;  %v859_v16 = vadd.f32 %v2220_v13, %v3334_v42  ;;  %v880_v17 = vmax.f32 %v824_v9, 0.0  ;;  %v2609_v9 = vld [vmem:[#allocation8 + $0x30] sm:$0xff]   ;;  %v2611_v10 = vld [vmem:[#allocation10] sm:$0xff]  }
 0x1d7   : > { %2361 = vmatprep.subr.bf16.mxu0 %v2611_v10  ;;  %v2613_v12 = vld [vmem:[#allocation10 + $0x10] sm:$0xff]   ;;  %v2615_v13 = vld [vmem:[#allocation10 + $0x20] sm:$0xff]  }
 0x1d8   : > { %v881_v18 = vmax.f32 %v827_v14, 0.0  ;;  %v2197_v19 = vpop.f32.mrb[8].mxu0  ;;  %v889_v21 = vmax.f32 %v859_v16, 0.0  ;;  %v2221_v22 = vpop.f32.mrb[8].mxu1  ;;  %2362 = vmatpush3.bf16.msra.mxu0 %v2611_v10  ;;  %v2616_v14 = vld [vmem:[#allocation10 + $0x28] sm:$0xff]   ;;  %v2618_v10 = vld [vmem:[#allocation10 + $0x38] sm:$0xff]  }
 0x1d9   : > { %v2198_v20 = vpop.f32.mrb[9].mxu0  ;;  %v2222_v26 = vpop.f32.mrb[9].mxu1  ;;  %2363 = vmatprep.subr.bf16.mxu0 %v2612_v11 }
 0x1da   : > { %v895_v23 = vpack.c.bf16 %v881_v18, %v880_v17  ;;  %v2199_v24 = vadd.f32 %v2198_v20, %v2197_v19  ;;  %v2200_v25 = vpop.f32.mrb[10].mxu0  ;;  %v2223_v29 = vadd.f32 %v2222_v26, %v2221_v22  ;;  %v2224_v30 = vpop.f32.mrb[10].mxu1  ;;  %v899_v31 = vpack.c.bf16 %v889_v21, %v888_v15  ;;  %v2107_v15 = vld [vmem:[%s3505_s4] ss:$0 sm:$0xff] }
 0x1db   : > { %v2201_v28 = vpop.f32.mrb[11].mxu0  ;;  %v2225_v34 = vpop.f32.mrb[11].mxu1 }
 0x1dc   : > { %v832_v32 = vadd.f32 %v2199_v24, %v3334_v42  ;;  %v2202_v33 = vadd.f32 %v2201_v28, %v2200_v25  ;;  %2314 = vmatmul.mubr.bf16.vlgmr.msra.gmra.mrb[16].mxu1 %v895_v23  ;;  %v864_v35 = vadd.f32 %v2223_v29, %v3334_v42  ;;  %v2226_v36 = vadd.f32 %v2225_v34, %v2224_v30 }
 0x1dd   : > { %2330 = vmatpush3.bf16.msra.mxu1 %v3328_v40  ;;  %v2606_v40 = vld [vmem:[#allocation8 + $0x18] sm:$0xff]   ;;  %2364 = vmatpush3.bf16.msra.mxu0 %v2612_v11  ;;  %v2619_v11 = vld [vmem:[#allocation11] sm:$0xff]  }
 0x1de   : > { %v835_v37 = vadd.f32 %v2202_v33, %v3334_v42  ;;  %2331 = vmatprep.subr.bf16.mxu1 %v2604_v27  ;;  %v890_v39 = vmax.f32 %v864_v35, 0.0  ;;  %v867_v41 = vadd.f32 %v2226_v36, %v3334_v42  ;;  %v882_v43 = vmax.f32 %v832_v32, 0.0  ;;  %2365 = vmatprep.subr.bf16.mxu0 %v2613_v12 }
 0x1e0   : > { %v883_v44 = vmax.f32 %v835_v37, 0.0  ;;  %v2203_v45 = vpop.f32.mrb[12].mxu0  ;;  %v891_v47 = vmax.f32 %v867_v41, 0.0  ;;  %v2227_v48 = vpop.f32.mrb[12].mxu1 }
 0x1e1   : > { %v2204_v46 = vpop.f32.mrb[13].mxu0  ;;  %2332 = vmatpush3.bf16.msra.mxu1 %v2604_v27  ;;  %v2228_v52 = vpop.f32.mrb[13].mxu1  ;;  %2366 = vmatpush3.bf16.msra.mxu0 %v2613_v12  ;;  %v2620_v12 = vld [vmem:[#allocation11 + $0x8] sm:$0xff]  }
 0x1e2   : > { %v2205_v49 = vadd.f32 %v2204_v46, %v2203_v45  ;;  %v2206_v50 = vpop.f32.mrb[14].mxu0  ;;  %v896_v51 = vpack.c.bf16 %v883_v44, %v882_v43  ;;  %2333 = vmatprep.subr.bf16.mxu1 %v2605_v38  ;;  %v2229_v54 = vadd.f32 %v2228_v52, %v2227_v48  ;;  %v2230_v55 = vpop.f32.mrb[14].mxu1  ;;  %v900_v56 = vpack.c.bf16 %v891_v47, %v890_v39 }
 0x1e3   : > { %v2207_v53 = vpop.f32.mrb[15].mxu0  ;;  %v2231_v59 = vpop.f32.mrb[15].mxu1 }
 0x1e4   : > { %v840_v57 = vadd.f32 %v2205_v49, %v3334_v42  ;;  %v2208_v58 = vadd.f32 %v2207_v53, %v2206_v50  ;;  %2317 = vmatprep.mubr.bf16.mxu1 %v896_v51  ;;  %v872_v60 = vadd.f32 %v2229_v54, %v3334_v42  ;;  %v2232_v61 = vadd.f32 %v2231_v59, %v2230_v55 }
 0x1e5   : > { %2334 = vmatpush3.bf16.msra.mxu1 %v2605_v38 }
 0x1e6   : > { %v843_v62 = vadd.f32 %v2208_v58, %v3334_v42  ;;  %2335 = vmatprep.subr.bf16.mxu1 %v2606_v40  ;;  %v892_v0 = vmax.f32 %v872_v60, 0.0  ;;  %v875_v1 = vadd.f32 %v2232_v61, %v3334_v42  ;;  %v884_v2 = vmax.f32 %v840_v57, 0.0  ;;  %v2610_v42 = vld [vmem:[#allocation8 + $0x38] sm:$0xff]  }
 0x1e8   : > { %v885_v3 = vmax.f32 %v843_v62, 0.0  ;;  %v893_v4 = vmax.f32 %v875_v1, 0.0 }
 0x1e9   : > { %2336 = vmatpush3.bf16.msra.mxu1 %v2606_v40 }
 0x1ea   : > { %v897_v5 = vpack.c.bf16 %v885_v3, %v884_v2  ;;  %2337 = vmatprep.subr.bf16.mxu1 %v2607_v63  ;;  %v901_v7 = vpack.c.bf16 %v893_v4, %v892_v0 }
 0x1ec   : > { %2318 = vmatmul.mubr.bf16.gmra.mrb[20].mxu1 %v897_v5 }
 0x1ed   : > { %2321 = vmatprep.mubr.bf16.mxu1 %v3340_v8  ;;  %2338 = vmatpush3.bf16.msra.mxu1 %v2607_v63  ;;  %v2614_v8 = vld [vmem:[#allocation10 + $0x18] sm:$0xff]  }
 0x1ee   : > { %2339 = vmatprep.subr.bf16.mxu1 %v2608_v6  ;;  %2367 = vmatprep.subr.bf16.mxu0 %v2614_v8 }
 0x1ef   : > { %2368 = vmatpush3.bf16.msra.mxu0 %v2614_v8  ;;  %v2621_v8 = vld [vmem:[#allocation11 + $0x10] sm:$0xff]  }
 0x1f0   : > { %2369 = vmatprep.subr.bf16.mxu0 %v2615_v13 }
 0x1f1   : > { %2340 = vmatpush3.bf16.msra.mxu1 %v2608_v6 }
 0x1f2   : > { %2341 = vmatprep.subr.bf16.mxu1 %v2609_v9 }
 0x1f3   : > { %2370 = vmatpush3.bf16.msra.mxu0 %v2615_v13  ;;  %v2622_v13 = vld [vmem:[#allocation11 + $0x18] sm:$0xff]  }
 0x1f4   : > { %2322 = vmatmul.mubr.bf16.gmra.mrb[24].mxu1 %v899_v31  ;;  %2371 = vmatprep.subr.bf16.mxu0 %v2616_v14 }
 0x1f5   : > { %2325 = vmatprep.mubr.bf16.mxu1 %v900_v56  ;;  %2342 = vmatpush3.bf16.msra.mxu1 %v2609_v9 }
 0x1f6   : > { %2343 = vmatprep.subr.bf16.mxu1 %v2610_v42 }
 0x1f7   : > { %2372 = vmatpush3.bf16.msra.mxu0 %v2616_v14  ;;  %v2623_v14 = vld [vmem:[#allocation11 + $0x20] sm:$0xff]  }
 0x1f9   : > { %2344 = vmatpush3.bf16.msra.mxu1 %v2610_v42  ;;  %v2617_v42 = vld [vmem:[#allocation10 + $0x30] sm:$0xff]  }
 0x1fa   : > { %2373 = vmatprep.subr.bf16.mxu0 %v2617_v42  ;;  %2393 = vmatprep.subr.bf16.mxu1 %v2619_v11 }
 0x1fb   : > { %2374 = vmatpush3.bf16.msra.mxu0 %v2617_v42 }
 0x1fc   : > { %2326 = vmatmul.mubr.bf16.gmra.mrb[28].mxu1 %v901_v7  ;;  %2375 = vmatprep.subr.bf16.mxu0 %v2618_v10 }
 0x1ff   : > { %2376 = vmatpush3.bf16.msra.mxu0 %v2618_v10 }
 0x2af   : > { %v2315_v16 = vpop.f32.mrb[16].mxu1 }
 0x2b0   : > { %v1016_v17 = vadd.f32 %v2315_v16, %v2107_v15  ;;  %v1007_v18 = vpop.f32.mrb[17].mxu1 }
 0x2b1   : > { %v1008_v19 = vadd.f32 %v2107_v15, %v1007_v18  ;;  %v2316_v20 = vpop.f32.mrb[18].mxu1 }
 0x2b2   : > { %v1019_v21 = vadd.f32 %v2316_v20, %v2107_v15  ;;  %v1010_v22 = vpop.f32.mrb[19].mxu1  ;;  %v1072_v24 = vmax.f32 %v1016_v17, 0.0  ;;  %v2116_v17 = vld [vmem:[%s3544_s8] ss:$0 sm:$0xff]  ;;  %s1922_s8 = sshll.u32 %s3386_s30, 4  ;;  %s3453_s8 = int_to_ptr.vmem [resolvable:$true] %s1922_s8 }
 0x2b3   : > { %v1011_v23 = vadd.f32 %v2107_v15, %v1010_v22  ;;  %v1070_v26 = vmax.f32 %v1008_v19, 0.0  ;;  %s2849_s24 = scalar_lea.vmem %s3453_s8, 4096 }
 0x2b4   : > { %v1073_v25 = vmax.f32 %v1019_v21, 0.0  ;;  %p2850_p6 = scmp.ne.s32.totalorder %s3453_s8, %s2849_s24 }
 0x2b5   : > { %v1071_v27 = vmax.f32 %v1011_v23, 0.0 }
 0x2b6   : > { %v1087_v28 = vpack.c.bf16 %v1073_v25, %v1072_v24  ;;  %p2851_p12 = pnand %p2850_p6, %p3549_p9 }
 0x2b7   : > { %v1086_v29 = vpack.c.bf16 %v1071_v27, %v1070_v26 }
 0x2b8   : > { %p2852_p1 = pneg %p2851_p12 }
 0x2b9   : > { %2345 = vmatprep.mubr.bf16.mxu1 %v1086_v29 }
 0x2ba   : > { %2346 = vmatmul.mubr.bf16.vlgmr.msra.gmra.mrb[32].mxu1 %v1087_v28 }
 0x2bb   : > { %2394 = vmatpush3.bf16.msra.mxu1 %v2619_v11 }
 0x2bc   : > { %2395 = vmatprep.subr.bf16.mxu1 %v2620_v12 }
 0x2bf   : > { %v2319_v30 = vpop.f32.mrb[20].mxu1  ;;  %2396 = vmatpush3.bf16.msra.mxu1 %v2620_v12 }
 0x2c0   : > { %v1032_v31 = vadd.f32 %v2319_v30, %v2107_v15  ;;  %v1023_v32 = vpop.f32.mrb[21].mxu1  ;;  %2397 = vmatprep.subr.bf16.mxu1 %v2621_v8 }
 0x2c1   : > { %v1024_v33 = vadd.f32 %v2107_v15, %v1023_v32  ;;  %v2320_v34 = vpop.f32.mrb[22].mxu1 }
 0x2c2   : > { %v1035_v35 = vadd.f32 %v2320_v34, %v2107_v15  ;;  %v1026_v36 = vpop.f32.mrb[23].mxu1  ;;  %v1076_v38 = vmax.f32 %v1032_v31, 0.0 }
 0x2c3   : > { %v1027_v37 = vadd.f32 %v2107_v15, %v1026_v36  ;;  %v1074_v41 = vmax.f32 %v1024_v33, 0.0  ;;  %2398 = vmatpush3.bf16.msra.mxu1 %v2621_v8 }
 0x2c4   : > { %v1077_v39 = vmax.f32 %v1035_v35, 0.0  ;;  %2399 = vmatprep.subr.bf16.mxu1 %v2622_v13 }
 0x2c5   : > { %v1075_v43 = vmax.f32 %v1027_v37, 0.0 }
 0x2c6   : > { %v1089_v44 = vpack.c.bf16 %v1077_v39, %v1076_v38 }
 0x2c7   : > { %v1088_v45 = vpack.c.bf16 %v1075_v43, %v1074_v41  ;;  %v2323_v46 = vpop.f32.mrb[24].mxu1  ;;  %2400 = vmatpush3.bf16.msra.mxu1 %v2622_v13 }
 0x2c8   : > { %v1048_v47 = vadd.f32 %v2323_v46, %v2107_v15  ;;  %v1039_v48 = vpop.f32.mrb[25].mxu1  ;;  %2401 = vmatprep.subr.bf16.mxu1 %v2623_v14 }
 0x2c9   : > { %v1040_v49 = vadd.f32 %v2107_v15, %v1039_v48  ;;  %v2324_v50 = vpop.f32.mrb[26].mxu1  ;;  %2349 = vmatprep.mubr.bf16.mxu1 %v1088_v45 }
 0x2ca   : > { %v1080_v51 = vmax.f32 %v1048_v47, 0.0  ;;  %v1051_v52 = vadd.f32 %v2324_v50, %v2107_v15  ;;  %v1042_v40 = vpop.f32.mrb[27].mxu1  ;;  %2350 = vmatmul.mubr.bf16.gmra.mrb[36].mxu1 %v1089_v44 }
 0x2cb   : > { %v1078_v53 = vmax.f32 %v1040_v49, 0.0  ;;  %v1043_v54 = vadd.f32 %v2107_v15, %v1042_v40  ;;  %2402 = vmatpush3.bf16.msra.mxu1 %v2623_v14 }
 0x2cc   : > { %v1081_v55 = vmax.f32 %v1051_v52, 0.0 }
 0x2cd   : > { %v1079_v56 = vmax.f32 %v1043_v54, 0.0 }
 0x2ce   : > { %v1091_v57 = vpack.c.bf16 %v1081_v55, %v1080_v51 }
 0x2cf   : > { %v1090_v58 = vpack.c.bf16 %v1079_v56, %v1078_v53  ;;  %v2327_v59 = vpop.f32.mrb[28].mxu1 }
 0x2d0   : > { %v1064_v60 = vadd.f32 %v2327_v59, %v2107_v15  ;;  %v1055_v61 = vpop.f32.mrb[29].mxu1  ;;  %v2626_v59 = vld [vmem:[#allocation11 + $0x38] sm:$0xff]  }
 0x2d1   : > { %v1056_v62 = vadd.f32 %v2107_v15, %v1055_v61  ;;  %v2328_v63 = vpop.f32.mrb[30].mxu1  ;;  %2353 = vmatprep.mubr.bf16.mxu1 %v1090_v58  ;;  %v2625_v58 = vld [vmem:[#allocation11 + $0x30] sm:$0xff]   ;;  %v2629_v61 = vld [vmem:[#allocation13 + $0x4] ss:$8 sps:$4 sm:$0xff]  }
 0x2d2   : > { %v1084_v0 = vmax.f32 %v1064_v60, 0.0  ;;  %v1067_v1 = vadd.f32 %v2328_v63, %v2107_v15  ;;  %v1058_v2 = vpop.f32.mrb[31].mxu1  ;;  %2354 = vmatmul.mubr.bf16.gmra.mrb[40].mxu1 %v1091_v57  ;;  %v2627_v60 = vld [vmem:[#allocation13] ss:$8 sps:$4 sm:$0xff]   ;;  %1762 = vmatprep.subr.bf16.mxu0 %v2629_v61  ;;  %v2630_v63 = vld [vmem:[#allocation13 + $0x10] ss:$8 sps:$4 sm:$0xff]  }
 0x2d3   : > { %v1082_v3 = vmax.f32 %v1056_v62, 0.0  ;;  %v1059_v4 = vadd.f32 %v2107_v15, %v1058_v2  ;;  %v2624_v15 = vld [vmem:[#allocation11 + $0x28] sm:$0xff]   ;;  %v2632_v62 = vld [vmem:[#allocation13 + $0x14] ss:$8 sps:$4 sm:$0xff]  }
 0x2d4   : > { %v1085_v5 = vmax.f32 %v1067_v1, 0.0  ;;  %2403 = vmatprep.subr.bf16.mxu1 %v2624_v15  ;;  %v2633_v1 = vld [vmem:[#allocation13 + $0x20] ss:$8 sps:$4 sm:$0xff]   ;;  %v2638_v2 = vld [vmem:[#allocation13 + $0x34] ss:$8 sps:$4 sm:$0xff]  }
 0x2d5   : > { %v1083_v6 = vmax.f32 %v1059_v4, 0.0  ;;  %2404 = vmatpush3.bf16.msra.mxu1 %v2624_v15  ;;  %v2641_v4 = vld [vmem:[#allocation13 + $0x44] ss:$8 sps:$4 sm:$0xff]  }
 0x2d6   : > { %v1093_v7 = vpack.c.bf16 %v1085_v5, %v1084_v0  ;;  %2405 = vmatprep.subr.bf16.mxu1 %v2625_v58  ;;  %v2635_v0 = vld [vmem:[#allocation13 + $0x24] ss:$8 sps:$4 sm:$0xff]   ;;  %v2639_v5 = vld [vmem:[#allocation13 + $0x40] ss:$8 sps:$4 sm:$0xff]  }
 0x2d7   : > { %v1092_v9 = vpack.c.bf16 %v1083_v6, %v1082_v3  ;;  %v2636_v3 = vld [vmem:[#allocation13 + $0x30] ss:$8 sps:$4 sm:$0xff]   ;;  %v2644_v6 = vld [vmem:[#allocation13 + $0x54] ss:$8 sps:$4 sm:$0xff]  }
 0x2d9   : > { %2357 = vmatprep.mubr.bf16.mxu1 %v1092_v9  ;;  %2406 = vmatpush3.bf16.msra.mxu1 %v2625_v58  ;;  %v2125_v9 = vld [vmem:[%s3545_s22] ss:$0 sm:$0xff]  ;;  %s3548_s22 = sld [smem:[#allocation25_spill]] }
 0x2da   : > { %2358 = vmatmul.mubr.bf16.gmra.mrb[44].mxu1 %v1093_v7  ;;  %2407 = vmatprep.subr.bf16.mxu1 %v2626_v59  ;;  %v2642_v7 = vld [vmem:[#allocation13 + $0x50] ss:$8 sps:$4 sm:$0xff]  }
 0x2dd   : > { %2408 = vmatpush3.bf16.msra.mxu1 %v2626_v59 }
 0x2df   : > { %s3451_s10 = scalar_lea.hbm %s3548_s22, %s2168_s1 }
 0x38d   : > { %v2347_v16 = vpop.f32.mrb[32].mxu1 }
 0x38e   : > { %v1199_v18 = vpop.f32.mrb[33].mxu1  ;;  %v1208_v20 = vadd.f32 %v2347_v16, %v2116_v17 }
 0x38f   : > { %v2348_v19 = vpop.f32.mrb[34].mxu1  ;;  %v1200_v23 = vadd.f32 %v2116_v17, %v1199_v18 }
 0x390   : > { %v1211_v21 = vadd.f32 %v2348_v19, %v2116_v17  ;;  %v1202_v22 = vpop.f32.mrb[35].mxu1 }
 0x391   : > { %v1203_v24 = vadd.f32 %v2116_v17, %v1202_v22 }
 0x392   : > { %v1263_v25 = vpack.c.bf16 %v1211_v21, %v1208_v20 }
 0x393   : > { %v1262_v26 = vpack.c.bf16 %v1203_v24, %v1200_v23 }
 0x395   : > { %2377 = vmatprep.mubr.bf16.mxu0 %v1262_v26 }
 0x396   : > { %2378 = vmatmul.mubr.bf16.vlgmr.msra.gmra.mrb[16].mxu0 %v1263_v25 }
 0x397   : > { %1763 = vmatpush1.bf16.msra.mxu0 %v2627_v60 }
 0x398   : > { %1764 = vmatprep.subr.bf16.mxu0 %v2632_v62 }
 0x39b   : > { %1765 = vmatpush1.bf16.msra.mxu0 %v2630_v63 }
 0x39c   : > { %1766 = vmatprep.subr.bf16.mxu0 %v2635_v0 }
 0x39d   : > { %v2351_v27 = vpop.f32.mrb[36].mxu1 }
 0x39e   : > { %v1215_v28 = vpop.f32.mrb[37].mxu1  ;;  %v1224_v30 = vadd.f32 %v2351_v27, %v2116_v17 }
 0x39f   : > { %v2352_v29 = vpop.f32.mrb[38].mxu1  ;;  %v1216_v33 = vadd.f32 %v2116_v17, %v1215_v28  ;;  %1767 = vmatpush1.bf16.msra.mxu0 %v2633_v1  ;;  %v2647_v1 = vld [vmem:[#allocation13 + $0x64] ss:$8 sps:$4 sm:$0xff]  }
 0x3a0   : > { %v1227_v31 = vadd.f32 %v2352_v29, %v2116_v17  ;;  %v1218_v32 = vpop.f32.mrb[39].mxu1  ;;  %1768 = vmatprep.subr.bf16.mxu0 %v2638_v2  ;;  %v2645_v2 = vld [vmem:[#allocation13 + $0x60] ss:$8 sps:$4 sm:$0xff]  }
 0x3a1   : > { %v1219_v34 = vadd.f32 %v2116_v17, %v1218_v32 }
 0x3a2   : > { %v1265_v35 = vpack.c.bf16 %v1227_v31, %v1224_v30 }
 0x3a3   : > { %v1264_v36 = vpack.c.bf16 %v1219_v34, %v1216_v33  ;;  %1769 = vmatpush1.bf16.msra.mxu0 %v2636_v3  ;;  %v2650_v3 = vld [vmem:[#allocation13 + $0x74] ss:$8 sps:$4 sm:$0xff]  }
 0x3a4   : > { %1770 = vmatprep.subr.bf16.mxu0 %v2641_v4  ;;  %v2648_v4 = vld [vmem:[#allocation13 + $0x70] ss:$8 sps:$4 sm:$0xff]  }
 0x3a5   : > { %v2355_v37 = vpop.f32.mrb[40].mxu1  ;;  %2381 = vmatprep.mubr.bf16.mxu0 %v1264_v36 }
 0x3a6   : > { %v1240_v38 = vadd.f32 %v2355_v37, %v2116_v17  ;;  %v1231_v39 = vpop.f32.mrb[41].mxu1  ;;  %2382 = vmatmul.mubr.bf16.gmra.mrb[20].mxu0 %v1265_v35 }
 0x3a7   : > { %v2356_v41 = vpop.f32.mrb[42].mxu1  ;;  %v1232_v45 = vadd.f32 %v2116_v17, %v1231_v39  ;;  %1771 = vmatpush1.bf16.msra.mxu0 %v2639_v5  ;;  %v2940_v5 = vmov 0  }
 0x3a8   : > { %v1243_v43 = vadd.f32 %v2356_v41, %v2116_v17  ;;  %v1234_v44 = vpop.f32.mrb[43].mxu1  ;;  %1772 = vmatprep.subr.bf16.mxu0 %v2644_v6  ;;  %v2134_v6 = vld [vmem:[%s3546_s21] ss:$0 sm:$0xff]  ;;  %s2941_s21 = smov [#allocation14]  }
 0x3a9   : > { %v1235_v46 = vadd.f32 %v2116_v17, %v1234_v44  ;;  %s2853_s15 = sshll.u32 %s2941_s21, 4  ;;  %s2854_s15 = int_to_ptr.vmem [resolvable:$false] %s2853_s15 }
 0x3aa   : > { %v1267_v47 = vpack.c.bf16 %v1243_v43, %v1240_v38  ;;  %s2855_s13 = scalar_lea.vmem %s2854_s15, 8192  ;;  %p2856_p13 = scmp.lt.s32.totalorder %s3453_s8, %s2854_s15 }
 0x3ab   : > { %v1266_v48 = vpack.c.bf16 %v1235_v46, %v1232_v45  ;;  %1773 = vmatpush1.bf16.msra.mxu0 %v2642_v7  ;;  %p2857_p0 = scmp.lt.s32.totalorder %s2855_s13, %s2849_s24 }
 0x3ac   : > { %1774 = vmatprep.subr.bf16.mxu0 %v2647_v1 }
 0x3ad   : > { %v2359_v49 = vpop.f32.mrb[44].mxu1  ;;  %2385 = vmatprep.mubr.bf16.mxu0 %v1266_v48  ;;  %p2858_p2 = por %p2857_p0, %p2856_p13 }
 0x3ae   : > { %v1256_v50 = vadd.f32 %v2359_v49, %v2116_v17  ;;  %v1247_v51 = vpop.f32.mrb[45].mxu1  ;;  %2386 = vmatmul.mubr.bf16.gmra.mrb[24].mxu0 %v1267_v47 }
 0x3af   : > { %v1248_v52 = vadd.f32 %v2116_v17, %v1247_v51  ;;  %v2360_v40 = vpop.f32.mrb[46].mxu1  ;;  %1775 = vmatpush1.bf16.msra.mxu0 %v2645_v2  ;;  %v1670_v2 = vld [vmem:[%s3547_s16] sm:$0x3]  ;;  %p2859_p8 = pnand %p2858_p2, %p2852_p1 }
 0x3b0   : > { %v1259_v53 = vadd.f32 %v2360_v40, %v2116_v17  ;;  %v1250_v54 = vpop.f32.mrb[47].mxu1  ;;  %1776 = vmatprep.subr.bf16.mxu0 %v2650_v3 }
 0x3b1   : > { %v1251_v55 = vadd.f32 %v2116_v17, %v1250_v54 }
 0x3b2   : > { %v1269_v56 = vpack.c.bf16 %v1259_v53, %v1256_v50 }
 0x3b3   : > { %v1268_v57 = vpack.c.bf16 %v1251_v55, %v1248_v52  ;;  %1777 = vmatpush1.bf16.msra.mxu0 %v2648_v4 }
 0x3b5   : > { %2389 = vmatprep.mubr.bf16.mxu0 %v1268_v57 }
 0x3b6   : > { %2390 = vmatmul.mubr.bf16.gmra.mrb[28].mxu0 %v1269_v56 }
 0x3b7   : > { %1794 = vmatprep.mubr.bf16.mxu0 %v2940_v5 }
 0x469   : > { %v2379_v42 = vpop.f32.mrb[16].mxu0 }
 0x46a   : > { %v1384_v10 = vadd.f32 %v2379_v42, %v2125_v9  ;;  %v1375_v11 = vpop.f32.mrb[17].mxu0 }
 0x46b   : > { %v1376_v12 = vadd.f32 %v2125_v9, %v1375_v11  ;;  %v2380_v8 = vpop.f32.mrb[18].mxu0 }
 0x46c   : > { %v1387_v13 = vadd.f32 %v2380_v8, %v2125_v9  ;;  %v1378_v14 = vpop.f32.mrb[19].mxu0  ;;  %v1440_v16 = vmax.f32 %v1384_v10, 0.0 }
 0x46d   : > { %v1379_v15 = vadd.f32 %v2125_v9, %v1378_v14  ;;  %v1438_v18 = vmax.f32 %v1376_v12, 0.0 }
 0x46e   : > { %v1441_v17 = vmax.f32 %v1387_v13, 0.0 }
 0x46f   : > { %v1439_v19 = vmax.f32 %v1379_v15, 0.0 }
 0x470   : > { %v1455_v20 = vpack.c.bf16 %v1441_v17, %v1440_v16 }
 0x471   : > { %v1454_v21 = vpack.c.bf16 %v1439_v19, %v1438_v18 }
 0x473   : > { %2409 = vmatprep.mubr.bf16.mxu1 %v1454_v21 }
 0x474   : > { %2410 = vmatmul.mubr.bf16.vlgmr.msra.gmra.mrb[48].mxu1 %v1455_v20 }
 0x479   : > { %v2383_v22 = vpop.f32.mrb[20].mxu0 }
 0x47a   : > { %v1400_v23 = vadd.f32 %v2383_v22, %v2125_v9  ;;  %v1391_v24 = vpop.f32.mrb[21].mxu0 }
 0x47b   : > { %v1392_v25 = vadd.f32 %v2125_v9, %v1391_v24  ;;  %v2384_v26 = vpop.f32.mrb[22].mxu0 }
 0x47c   : > { %v1403_v27 = vadd.f32 %v2384_v26, %v2125_v9  ;;  %v1394_v28 = vpop.f32.mrb[23].mxu0  ;;  %v1444_v30 = vmax.f32 %v1400_v23, 0.0 }
 0x47d   : > { %v1395_v29 = vadd.f32 %v2125_v9, %v1394_v28  ;;  %v1442_v32 = vmax.f32 %v1392_v25, 0.0 }
 0x47e   : > { %v1445_v31 = vmax.f32 %v1403_v27, 0.0 }
 0x47f   : > { %v1443_v33 = vmax.f32 %v1395_v29, 0.0 }
 0x480   : > { %v1457_v34 = vpack.c.bf16 %v1445_v31, %v1444_v30 }
 0x481   : > { %v1456_v35 = vpack.c.bf16 %v1443_v33, %v1442_v32  ;;  %v2387_v36 = vpop.f32.mrb[24].mxu0 }
 0x482   : > { %v1416_v37 = vadd.f32 %v2387_v36, %v2125_v9  ;;  %v1407_v38 = vpop.f32.mrb[25].mxu0 }
 0x483   : > { %v1408_v39 = vadd.f32 %v2125_v9, %v1407_v38  ;;  %v2388_v41 = vpop.f32.mrb[26].mxu0  ;;  %2413 = vmatprep.mubr.bf16.mxu1 %v1456_v35 }
 0x484   : > { %v1419_v43 = vadd.f32 %v2388_v41, %v2125_v9  ;;  %v1410_v44 = vpop.f32.mrb[27].mxu0  ;;  %2414 = vmatmul.mubr.bf16.gmra.mrb[52].mxu1 %v1457_v34  ;;  %v1448_v46 = vmax.f32 %v1416_v37, 0.0 }
 0x485   : > { %v1411_v45 = vadd.f32 %v2125_v9, %v1410_v44  ;;  %v1446_v48 = vmax.f32 %v1408_v39, 0.0 }
 0x486   : > { %v1449_v47 = vmax.f32 %v1419_v43, 0.0 }
 0x487   : > { %v1447_v49 = vmax.f32 %v1411_v45, 0.0 }
 0x488   : > { %v1459_v50 = vpack.c.bf16 %v1449_v47, %v1448_v46 }
 0x489   : > { %v1458_v51 = vpack.c.bf16 %v1447_v49, %v1446_v48  ;;  %v2391_v52 = vpop.f32.mrb[28].mxu0 }
 0x48a   : > { %v1432_v40 = vadd.f32 %v2391_v52, %v2125_v9  ;;  %v1423_v53 = vpop.f32.mrb[29].mxu0 }
 0x48b   : > { %v1424_v54 = vadd.f32 %v2125_v9, %v1423_v53  ;;  %v2392_v55 = vpop.f32.mrb[30].mxu0  ;;  %2417 = vmatprep.mubr.bf16.mxu1 %v1458_v51 }
 0x48c   : > { %v1452_v56 = vmax.f32 %v1432_v40, 0.0  ;;  %v1435_v57 = vadd.f32 %v2392_v55, %v2125_v9  ;;  %v1426_v58 = vpop.f32.mrb[31].mxu0  ;;  %2418 = vmatmul.mubr.bf16.gmra.mrb[56].mxu1 %v1459_v50 }
 0x48d   : > { %v1450_v59 = vmax.f32 %v1424_v54, 0.0  ;;  %v1427_v60 = vadd.f32 %v2125_v9, %v1426_v58 }
 0x48e   : > { %v1453_v61 = vmax.f32 %v1435_v57, 0.0 }
 0x48f   : > { %v1451_v62 = vmax.f32 %v1427_v60, 0.0 }
 0x490   : > { %v1461_v63 = vpack.c.bf16 %v1453_v61, %v1452_v56 }
 0x491   : > { %v1460_v0 = vpack.c.bf16 %v1451_v62, %v1450_v59 }
 0x493   : > { %2421 = vmatprep.mubr.bf16.mxu1 %v1460_v0 }
 0x494   : > { %2422 = vmatmul.mubr.bf16.gmra.mrb[60].mxu1 %v1461_v63  ;;  %v1672_v63 = vlaneseq }
 0x496   : > { %v1673_v0 = vshrl.u32 %v1672_v63, 7 }
 0x498   : > { %v1674_v1 = vsub.s32 0, %v1673_v0  ;;  %v1678_v3 = vsub.s32 1, %v1673_v0 }
 0x49a   : > { %v3380_v4 = vrot.slane %v1670_v2, %v1674_v1 }
 0x547   : > { %v2411_v7 = vpop.f32.mrb[48].mxu1 }
 0x548   : > { %v1576_v9 = vadd.f32 %v2411_v7, %v2134_v6  ;;  %v1567_v42 = vpop.f32.mrb[49].mxu1 }
 0x549   : > { %v1568_v10 = vadd.f32 %v2134_v6, %v1567_v42  ;;  %v2412_v11 = vpop.f32.mrb[50].mxu1 }
 0x54a   : > { %v1579_v12 = vadd.f32 %v2412_v11, %v2134_v6  ;;  %v1570_v8 = vpop.f32.mrb[51].mxu1  ;;  %v1632_v14 = vmax.f32 %v1576_v9, 0.0 }
 0x54b   : > { %v1571_v13 = vadd.f32 %v2134_v6, %v1570_v8  ;;  %v1630_v16 = vmax.f32 %v1568_v10, 0.0 }
 0x54c   : > { %v1633_v15 = vmax.f32 %v1579_v12, 0.0 }
 0x54d   : > { %v1631_v17 = vmax.f32 %v1571_v13, 0.0 }
 0x54e   : > { %v1647_v18 = vpack.c.bf16 %v1633_v15, %v1632_v14 }
 0x54f   : > { %v1646_v19 = vpack.c.bf16 %v1631_v17, %v1630_v16 }
 0x551   : > { %1795 = vmatmul.mubr.bf16.vlgmr.msra.gmra.mrb[32].mxu0 %v1646_v19 }
 0x552   : > { %1804 = vmatprep.mubr.bf16.mxu0 %v2940_v5 }
 0x557   : > { %v2415_v20 = vpop.f32.mrb[52].mxu1 }
 0x558   : > { %v1592_v21 = vadd.f32 %v2415_v20, %v2134_v6  ;;  %v1583_v22 = vpop.f32.mrb[53].mxu1 }
 0x559   : > { %v1584_v23 = vadd.f32 %v2134_v6, %v1583_v22  ;;  %v2416_v24 = vpop.f32.mrb[54].mxu1  ;;  %1805 = vmatmul.mubr.bf16.gmra.mrb[36].mxu0 %v1647_v18 }
 0x55a   : > { %v1595_v25 = vadd.f32 %v2416_v24, %v2134_v6  ;;  %v1586_v26 = vpop.f32.mrb[55].mxu1  ;;  %1814 = vmatprep.mubr.bf16.mxu0 %v2940_v5  ;;  %v1636_v28 = vmax.f32 %v1592_v21, 0.0 }
 0x55b   : > { %v1587_v27 = vadd.f32 %v2134_v6, %v1586_v26  ;;  %v1634_v30 = vmax.f32 %v1584_v23, 0.0 }
 0x55c   : > { %v1637_v29 = vmax.f32 %v1595_v25, 0.0 }
 0x55d   : > { %v1635_v31 = vmax.f32 %v1587_v27, 0.0 }
 0x55e   : > { %v1649_v32 = vpack.c.bf16 %v1637_v29, %v1636_v28 }
 0x55f   : > { %v1648_v33 = vpack.c.bf16 %v1635_v31, %v1634_v30  ;;  %v2419_v34 = vpop.f32.mrb[56].mxu1 }
 0x560   : > { %v1608_v35 = vadd.f32 %v2419_v34, %v2134_v6  ;;  %v1599_v36 = vpop.f32.mrb[57].mxu1 }
 0x561   : > { %v1600_v37 = vadd.f32 %v2134_v6, %v1599_v36  ;;  %v2420_v38 = vpop.f32.mrb[58].mxu1  ;;  %1815 = vmatmul.mubr.bf16.gmra.mrb[40].mxu0 %v1648_v33 }
 0x562   : > { %v1611_v39 = vadd.f32 %v2420_v38, %v2134_v6  ;;  %v1602_v41 = vpop.f32.mrb[59].mxu1  ;;  %1824 = vmatprep.mubr.bf16.mxu0 %v2940_v5  ;;  %v1640_v44 = vmax.f32 %v1608_v35, 0.0 }
 0x563   : > { %v1603_v43 = vadd.f32 %v2134_v6, %v1602_v41  ;;  %v1638_v46 = vmax.f32 %v1600_v37, 0.0 }
 0x564   : > { %v1641_v45 = vmax.f32 %v1611_v39, 0.0 }
 0x565   : > { %v1639_v47 = vmax.f32 %v1603_v43, 0.0 }
 0x566   : > { %v1651_v48 = vpack.c.bf16 %v1641_v45, %v1640_v44 }
 0x567   : > { %v1650_v49 = vpack.c.bf16 %v1639_v47, %v1638_v46  ;;  %v2423_v50 = vpop.f32.mrb[60].mxu1 }
 0x568   : > { %v1624_v51 = vadd.f32 %v2423_v50, %v2134_v6  ;;  %v1615_v52 = vpop.f32.mrb[61].mxu1 }
 0x569   : > { %v1616_v40 = vadd.f32 %v2134_v6, %v1615_v52  ;;  %v2424_v53 = vpop.f32.mrb[62].mxu1  ;;  %1825 = vmatmul.mubr.bf16.gmra.mrb[44].mxu0 %v1649_v32 }
 0x56a   : > { %v1644_v54 = vmax.f32 %v1624_v51, 0.0  ;;  %v1627_v55 = vadd.f32 %v2424_v53, %v2134_v6  ;;  %v1618_v56 = vpop.f32.mrb[63].mxu1  ;;  %1834 = vmatprep.mubr.bf16.mxu0 %v2940_v5 }
 0x56b   : > { %v1619_v57 = vadd.f32 %v2134_v6, %v1618_v56  ;;  %v1642_v59 = vmax.f32 %v1616_v40, 0.0  ;;  %v3382_v6 = vrot.slane %v1670_v2, %v1678_v3 }
 0x56c   : > { %v1645_v58 = vmax.f32 %v1627_v55, 0.0 }
 0x56d   : > { %v1643_v60 = vmax.f32 %v1619_v57, 0.0 }
 0x56e   : > { %v1653_v61 = vpack.c.bf16 %v1645_v58, %v1644_v54 }
 0x56f   : > { %v1652_v62 = vpack.c.bf16 %v1643_v60, %v1642_v59 }
 0x571   : > { %1835 = vmatmul.mubr.bf16.gmra.mrb[48].mxu0 %v1650_v49 }
 0x572   : > { %1844 = vmatprep.mubr.bf16.mxu0 %v2940_v5 }
 0x579   : > { %1845 = vmatmul.mubr.bf16.gmra.mrb[52].mxu0 %v1651_v48 }
 0x57a   : > { %1854 = vmatprep.mubr.bf16.mxu0 %v2940_v5 }
 0x581   : > { %1855 = vmatmul.mubr.bf16.gmra.mrb[56].mxu0 %v1652_v62 }
 0x582   : > { %1864 = vmatprep.mubr.bf16.mxu0 %v2940_v5 }
 0x589   : > { %1865 = vmatmul.mubr.bf16.gmra.mrb[60].mxu0 %v1653_v61 }
 0x624   : > { %v1796_v7 = vpop.f32.mrb[32].mxu0 }
 0x625   : > { %v1797_v9 = vadd.f32 %v1796_v7, %v3380_v4  ;;  %v1798_v42 = vpop.f32.mrb[33].mxu0 }
 0x626   : > { %v1799_v5 = vadd.f32 %v1798_v42, %v3382_v6  ;;  %v1800_v10 = vpop.f32.mrb[34].mxu0 }
 0x627   : > { %1875 = vst [vmem:[%s3386_s30] sm:$0xff] %v1797_v9  ;;  %v1801_v11 = vadd.f32 %v1800_v10, %v3380_v4  ;;  %v1802_v12 = vpop.f32.mrb[35].mxu0 }
 0x628   : > { %1876 = vst [vmem:[%s3386_s30 + $0x8] sm:$0xff] %v1799_v5  ;;  %v1803_v8 = vadd.f32 %v1802_v12, %v3382_v6 }
 0x629   : > { %1877 = vst [vmem:[%s3386_s30 + $0x10] sm:$0xff] %v1801_v11 }
 0x62a   : > { %1878 = vst [vmem:[%s3386_s30 + $0x18] sm:$0xff] %v1803_v8 }
 0x62c   : > { %v1806_v13 = vpop.f32.mrb[36].mxu0 }
 0x62d   : > { %v1807_v14 = vadd.f32 %v1806_v13, %v3380_v4  ;;  %v1808_v15 = vpop.f32.mrb[37].mxu0 }
 0x62e   : > { %v1809_v16 = vadd.f32 %v1808_v15, %v3382_v6  ;;  %v1810_v17 = vpop.f32.mrb[38].mxu0 }
 0x62f   : > { %1879 = vst [vmem:[%s3386_s30 + $0x20] sm:$0xff] %v1807_v14  ;;  %v1811_v18 = vadd.f32 %v1810_v17, %v3380_v4  ;;  %v1812_v19 = vpop.f32.mrb[39].mxu0 }
 0x630   : > { %1880 = vst [vmem:[%s3386_s30 + $0x28] sm:$0xff] %v1809_v16  ;;  %v1813_v20 = vadd.f32 %v1812_v19, %v3382_v6 }
 0x631   : > { %1881 = vst [vmem:[%s3386_s30 + $0x30] sm:$0xff] %v1811_v18 }
 0x632   : > { %1882 = vst [vmem:[%s3386_s30 + $0x38] sm:$0xff] %v1813_v20 }
 0x634   : > { %v1816_v21 = vpop.f32.mrb[40].mxu0 }
 0x635   : > { %v1817_v22 = vadd.f32 %v1816_v21, %v3380_v4  ;;  %v1818_v23 = vpop.f32.mrb[41].mxu0 }
 0x636   : > { %v1819_v24 = vadd.f32 %v1818_v23, %v3382_v6  ;;  %v1820_v25 = vpop.f32.mrb[42].mxu0 }
 0x637   : > { %1883 = vst [vmem:[%s3386_s30 + $0x40] sm:$0xff] %v1817_v22  ;;  %v1821_v26 = vadd.f32 %v1820_v25, %v3380_v4  ;;  %v1822_v27 = vpop.f32.mrb[43].mxu0 }
 0x638   : > { %1884 = vst [vmem:[%s3386_s30 + $0x48] sm:$0xff] %v1819_v24  ;;  %v1823_v28 = vadd.f32 %v1822_v27, %v3382_v6 }
 0x639   : > { %1885 = vst [vmem:[%s3386_s30 + $0x50] sm:$0xff] %v1821_v26 }
 0x63a   : > { %1886 = vst [vmem:[%s3386_s30 + $0x58] sm:$0xff] %v1823_v28 }
 0x63c   : > { %v1826_v29 = vpop.f32.mrb[44].mxu0 }
 0x63d   : > { %v1827_v30 = vadd.f32 %v1826_v29, %v3380_v4  ;;  %v1828_v31 = vpop.f32.mrb[45].mxu0 }
 0x63e   : > { %v1829_v32 = vadd.f32 %v1828_v31, %v3382_v6  ;;  %v1830_v33 = vpop.f32.mrb[46].mxu0 }
 0x63f   : > { %1887 = vst [vmem:[%s3386_s30 + $0x60] sm:$0xff] %v1827_v30  ;;  %v1831_v34 = vadd.f32 %v1830_v33, %v3380_v4  ;;  %v1832_v35 = vpop.f32.mrb[47].mxu0 }
 0x640   : > { %1888 = vst [vmem:[%s3386_s30 + $0x68] sm:$0xff] %v1829_v32  ;;  %v1833_v36 = vadd.f32 %v1832_v35, %v3382_v6 }
 0x641   : > { %1889 = vst [vmem:[%s3386_s30 + $0x70] sm:$0xff] %v1831_v34 }
 0x642   : > { %1890 = vst [vmem:[%s3386_s30 + $0x78] sm:$0xff] %v1833_v36 }
 0x644   : > { %v1836_v37 = vpop.f32.mrb[48].mxu0 }
 0x645   : > { %v1837_v38 = vadd.f32 %v1836_v37, %v3380_v4  ;;  %v1838_v39 = vpop.f32.mrb[49].mxu0 }
 0x646   : > { %v1839_v41 = vadd.f32 %v1838_v39, %v3382_v6  ;;  %v1840_v43 = vpop.f32.mrb[50].mxu0 }
 0x647   : > { %1891 = vst [vmem:[%s3386_s30 + $0x80] sm:$0xff] %v1837_v38  ;;  %v1841_v44 = vadd.f32 %v1840_v43, %v3380_v4  ;;  %v1842_v45 = vpop.f32.mrb[51].mxu0 }
 0x648   : > { %1892 = vst [vmem:[%s3386_s30 + $0x88] sm:$0xff] %v1839_v41  ;;  %v1843_v46 = vadd.f32 %v1842_v45, %v3382_v6 }
 0x649   : > { %1893 = vst [vmem:[%s3386_s30 + $0x90] sm:$0xff] %v1841_v44 }
 0x64a   : > { %1894 = vst [vmem:[%s3386_s30 + $0x98] sm:$0xff] %v1843_v46 }
 0x64c   : > { %v1846_v47 = vpop.f32.mrb[52].mxu0 }
 0x64d   : > { %v1847_v48 = vadd.f32 %v1846_v47, %v3380_v4  ;;  %v1848_v49 = vpop.f32.mrb[53].mxu0 }
 0x64e   : > { %v1849_v50 = vadd.f32 %v1848_v49, %v3382_v6  ;;  %v1850_v51 = vpop.f32.mrb[54].mxu0 }
 0x64f   : > { %1895 = vst [vmem:[%s3386_s30 + $0xa0] sm:$0xff] %v1847_v48  ;;  %v1851_v52 = vadd.f32 %v1850_v51, %v3380_v4  ;;  %v1852_v40 = vpop.f32.mrb[55].mxu0 }
 0x650   : > { %1896 = vst [vmem:[%s3386_s30 + $0xa8] sm:$0xff] %v1849_v50  ;;  %v1853_v53 = vadd.f32 %v1852_v40, %v3382_v6 }
 0x651   : > { %1897 = vst [vmem:[%s3386_s30 + $0xb0] sm:$0xff] %v1851_v52 }
 0x652   : > { %1898 = vst [vmem:[%s3386_s30 + $0xb8] sm:$0xff] %v1853_v53 }
 0x654   : > { %v1856_v54 = vpop.f32.mrb[56].mxu0 }
 0x655   : > { %v1857_v55 = vadd.f32 %v1856_v54, %v3380_v4  ;;  %v1858_v56 = vpop.f32.mrb[57].mxu0 }
 0x656   : > { %v1859_v57 = vadd.f32 %v1858_v56, %v3382_v6  ;;  %v1860_v58 = vpop.f32.mrb[58].mxu0 }
 0x657   : > { %1899 = vst [vmem:[%s3386_s30 + $0xc0] sm:$0xff] %v1857_v55  ;;  %v1861_v59 = vadd.f32 %v1860_v58, %v3380_v4  ;;  %v1862_v60 = vpop.f32.mrb[59].mxu0 }
 0x658   : > { %1900 = vst [vmem:[%s3386_s30 + $0xc8] sm:$0xff] %v1859_v57  ;;  %v1863_v61 = vadd.f32 %v1862_v60, %v3382_v6 }
 0x659   : > { %1901 = vst [vmem:[%s3386_s30 + $0xd0] sm:$0xff] %v1861_v59 }
 0x65a   : > { %1902 = vst [vmem:[%s3386_s30 + $0xd8] sm:$0xff] %v1863_v61 }
 0x65c   : > { %v1866_v62 = vpop.f32.mrb[60].mxu0 }
 0x65d   : > { %v1867_v63 = vadd.f32 %v1866_v62, %v3380_v4  ;;  %v1868_v0 = vpop.f32.mrb[61].mxu0 }
 0x65e   : > { %v1869_v1 = vadd.f32 %v1868_v0, %v3382_v6  ;;  %v1870_v2 = vpop.f32.mrb[62].mxu0 }
 0x65f   : > { %1903 = vst [vmem:[%s3386_s30 + $0xe0] sm:$0xff] %v1867_v63  ;;  %v1871_v3 = vadd.f32 %v1870_v2, %v3380_v4  ;;  %v1872_v7 = vpop.f32.mrb[63].mxu0 }
 0x660   : > { %1904 = vst [vmem:[%s3386_s30 + $0xe8] sm:$0xff] %v1869_v1  ;;  %v1873_v9 = vadd.f32 %v1872_v7, %v3382_v6 }
 0x661   : > { %1905 = vst [vmem:[%s3386_s30 + $0xf0] sm:$0xff] %v1871_v3 }
 0x662   : > { %1906 = vst [vmem:[%s3386_s30 + $0xf8] sm:$0xff] %v1873_v9 }
 0x663   : > { %2862 = shalt.err (!%p2859_p8)
}
 0x664   : > { %s2863_s16 = scalar_lea.hbm %s3451_s10, 4096  ;;  %s2867_s1 = scalar_lea.hbm %s3548_s22, 8192 }
 0x665   : > { %p2864_p4 = scmp.ne.s32.totalorder %s3451_s10, %s2863_s16  ;;  %p2868_p3 = scmp.lt.u32.totalorder %s3451_s10, %s3548_s22 }
 0x666   : > { %p2869_p5 = scmp.lt.u32.totalorder %s2867_s1, %s2863_s16  ;;  %p2871_p6 = scmp.lt.u32.totalorder %s2863_s16, %s3451_s10 }
 0x667   : > { %p2865_p10 = pnand %p2864_p4, %p3549_p9 }
 0x668   : > { %p2870_p7 = por %p2869_p5, %p2868_p3 }
 0x669   : > { %p2866_p11 = pneg %p2865_p10 }
 0x66a   : > { %p2872_p12 = por %p2871_p6, %p2870_p7 }
 0x66c   : > { %p2873_p1 = pnand %p2872_p12, %p2866_p11 }
 0x66e   : > { %2876 = shalt.err (!%p2873_p1)
}
 0x66f   : > { %s2942_s24 = smov 256   ;;  %s2943_s21 = smov 16  }
 0x670   : > { %2467 = dma.vmem_to_hbm [thread:$0]  (%p3549_p9), %s3453_s8, 4096, %s3451_s10, %s1908_s14, %s2942_s24, %s2942_s24, %s2943_s21  }
 0x671 PF: > { %s1937_s15 = sand.u32 1, %s2915_s25   ;;  %p3550_p13 = scmp.ne.s32.totalorder %s3534_s19, 0 }
 0x672   : > { %p3551_p0 = scmp.ge.s32.totalorder %s2927_s28, 2  ;;  %s1938_s13 = scalar_lea.sflag [#allocation4], %s1937_s15 }
 0x674   : > { %p2493_p2 = pnand %p3551_p0, %p3550_p13 }
 0x676   : > { %2910 = dma.done.wait (!%p2493_p2), %s1938_s13, 4096  }
 0x677   : > { %2912 = vsyncadd (!%p2493_p2), %s1938_s13, 4294963200  ;;  %p29_p8 = scmp.ge.s32.totalorder %s3208_s20, 4   ;;  %s3552_s25 = smov %s2919_s26 }
 0x678   : > { %s3553_s26 = smov %s2923_s27  ;;  %s3554_s27 = smov %s3219_s18 }
 0x679   : > { %s3555_s28 = smov %s3208_s20  ;;  %31 = sbr.rel (!%p29_p8) target bundleno = 15 (0xf), region = 141 }
 0x680   :  { %1943 = vsyncpa [#allocation3], 1 }
 0x681   :  { %1945 = vsyncpa [#allocation3 + $0x1], 1 }
 0x682   :  { %1946 = vsyncpa [#allocation6], 1 }
 0x683   :  { %1947 = vsyncpa [#allocation9], 1 }
 0x684   :  { %1948 = vsyncpa [#allocation12], 1 }
 0x685   :  { %1949 = vsyncpa [#allocation4], 1 }
 0x686   :  { %1951 = vsyncpa [#allocation4 + $0x1], 1 }

</bundles_post_ra>
